<compile_context>
chip_gen: v6e
topology: v6e:2x2x1
jax: 0.10.0
libtpu: 0.0.40
codegen_flags: <defaults>
</compile_context>

<pallas_src>
import functools

import jax
import jax.numpy as jnp
from jax.experimental import pallas as pl
from jax.experimental.pallas import tpu as pltpu


def _layer_norm(x, g, b, eps=1e-5):
    mu = jnp.mean(x, axis=-1, keepdims=True)
    var = jnp.mean((x - mu) * (x - mu), axis=-1, keepdims=True)
    return (x - mu) * jax.lax.rsqrt(var + eps) * g + b


def encoder_layer_kernel(srcq_ref, posq_ref, srcf_ref, posf_ref,
                         wq_ref, bq_ref, wk_ref, bk_ref, wv_ref, bv_ref,
                         wo_ref, bo_ref, w1_ref, b1_ref, w2_ref, b2_ref,
                         g1_ref, be1_ref, g2_ref, be2_ref,
                         *refs, nhead, head_dim, emit_weights):
    if emit_weights:
        out_ref, attnw_ref, k_scr, v_scr, ctx_scr = refs
    else:
        out_ref, k_scr, v_scr, ctx_scr = refs
        attnw_ref = None

    qi = pl.program_id(1)

    # ---- K / V projections for the FULL sequence, once per batch element ----
    # (full-width (S,D)@(D,D) bf16 matmuls, results cached in VMEM scratch across q-tiles)
    @pl.when(qi == 0)
    def _():
        srcf = srcf_ref[0]                                       # (S, D) f32
        posf = posf_ref[0]
        kin = (srcf + posf).astype(jnp.bfloat16)
        vin = srcf.astype(jnp.bfloat16)
        k_all = jnp.dot(kin, wk_ref[...],
                        preferred_element_type=jnp.float32) + bk_ref[...]
        v_all = jnp.dot(vin, wv_ref[...],
                        preferred_element_type=jnp.float32) + bv_ref[...]
        k_scr[...] = k_all.astype(jnp.bfloat16)
        v_scr[...] = v_all.astype(jnp.bfloat16)

    # ---- Q projection for this query tile (scale already folded into wq/bq) ----
    srcq = srcq_ref[0]                                           # (TQ, D) f32
    posq = posq_ref[0]
    qin = (srcq + posq).astype(jnp.bfloat16)
    q = jnp.dot(qin, wq_ref[...], preferred_element_type=jnp.float32) + bq_ref[...]
    q = q.astype(jnp.bfloat16)                                   # (TQ, D)

    # ---- per-head scores / softmax / context (small matmuls stay per-head) ----
    for h in range(nhead):
        sl = slice(h * head_dim, (h + 1) * head_dim)
        q_h = q[:, sl]                                           # (TQ, hd) bf16
        k_h = k_scr[:, sl]                                       # (S, hd) bf16
        v_h = v_scr[:, sl]                                       # (S, hd) bf16

        scores = jax.lax.dot_general(q_h, k_h, (((1,), (1,)), ((), ())),
                                     preferred_element_type=jnp.float32)  # (TQ, S)
        scores = scores - jnp.max(scores, axis=-1, keepdims=True)
        e = jnp.exp(scores)
        denom = jnp.sum(e, axis=-1, keepdims=True)
        probs = e * pl.reciprocal(denom, approx=True)            # f32 (TQ, S)

        if emit_weights:
            if h == 0:
                attnw_ref[0] = probs
            else:
                attnw_ref[0] += probs

        ctx_h = jnp.dot(probs.astype(jnp.bfloat16), v_h,
                        preferred_element_type=jnp.float32)      # (TQ, hd)
        ctx_scr[:, sl] = ctx_h.astype(jnp.bfloat16)

    if emit_weights:
        attnw_ref[0] = attnw_ref[0] * (1.0 / nhead)

    # ---- single full-width output projection ----
    attn = jnp.dot(ctx_scr[...], wo_ref[...],
                   preferred_element_type=jnp.float32) + bo_ref[...]

    # residual + LayerNorm1 (eps=1e-5, biased variance, like nn.LayerNorm)
    x = _layer_norm(srcq + attn, g1_ref[...], be1_ref[...])

    # FFN (dropout = identity in eval)
    hdn = jnp.maximum(
        jnp.dot(x.astype(jnp.bfloat16), w1_ref[...],
                preferred_element_type=jnp.float32) + b1_ref[...], 0.0)
    ff = jnp.dot(hdn.astype(jnp.bfloat16), w2_ref[...],
                 preferred_element_type=jnp.float32) + b2_ref[...]

    # residual + LayerNorm2
    out_ref[0] = _layer_norm(x + ff, g2_ref[...], be2_ref[...])


def prepare_layer_params(p, nhead):
    """Host-side, one-time: fold 1/sqrt(head_dim) into wq/bq, cast matmul weights to bf16."""
    D = p["wq"].shape[0]
    scale = float(D // nhead) ** -0.5
    return {
        "wq": (p["wq"] * scale).astype(jnp.bfloat16),
        "bq": p["bq"] * scale,
        "wk": p["wk"].astype(jnp.bfloat16), "bk": p["bk"],
        "wv": p["wv"].astype(jnp.bfloat16), "bv": p["bv"],
        "wo": p["wo"].astype(jnp.bfloat16), "bo": p["bo"],
        "w1": p["w1"].astype(jnp.bfloat16), "b1": p["b1"],
        "w2": p["w2"].astype(jnp.bfloat16), "b2": p["b2"],
        "g1": p["g1"], "be1": p["be1"],
        "g2": p["g2"], "be2": p["be2"],
    }


def encoder_layer_pallas(x, pos, p, *, nhead, q_tile=None, return_weights=False):
    """x, pos: (B, S, D) f32. p: prepared params. Returns (out, attn_weights | None)."""
    B, S, D = x.shape
    F_ = p["w1"].shape[1]
    head_dim = D // nhead

    if q_tile is None:
        q_tile = next((t for t in (256, 128) if S % t == 0), S)
    assert S % q_tile == 0, "q_tile must divide S"
    n_q = S // q_tile

    kernel = functools.partial(encoder_layer_kernel, nhead=nhead,
                               head_dim=head_dim, emit_weights=return_weights)

    def w_spec(shape):
        return pl.BlockSpec(shape, lambda b, q: (0, 0))

    qtile_spec = pl.BlockSpec((1, q_tile, D), lambda b, q: (b, q, 0))
    full_spec = pl.BlockSpec((1, S, D), lambda b, q: (b, 0, 0))

    in_specs = [
        qtile_spec, qtile_spec,            # src, pos (query tile)
        full_spec, full_spec,              # src, pos (full sequence, for K/V)
        w_spec((D, D)), w_spec((1, D)),    # wq (pre-scaled), bq (pre-scaled)
        w_spec((D, D)), w_spec((1, D)),    # wk, bk
        w_spec((D, D)), w_spec((1, D)),    # wv, bv
        w_spec((D, D)), w_spec((1, D)),    # wo, bo
        w_spec((D, F_)), w_spec((1, F_)),  # w1, b1
        w_spec((F_, D)), w_spec((1, D)),   # w2, b2
        w_spec((1, D)), w_spec((1, D)),    # g1, be1
        w_spec((1, D)), w_spec((1, D)),    # g2, be2
    ]

    out_specs = [pl.BlockSpec((1, q_tile, D), lambda b, q: (b, q, 0))]
    out_shape = [jax.ShapeDtypeStruct((B, S, D), jnp.float32)]
    if return_weights:
        out_specs.append(pl.BlockSpec((1, q_tile, S), lambda b, q: (b, q, 0)))
        out_shape.append(jax.ShapeDtypeStruct((B, S, S), jnp.float32))

    scratch_shapes = [
        pltpu.VMEM((S, D), jnp.bfloat16),       # K, full sequence
        pltpu.VMEM((S, D), jnp.bfloat16),       # V, full sequence
        pltpu.VMEM((q_tile, D), jnp.bfloat16),  # per-tile context, heads packed in lanes
    ]

    outs = pl.pallas_call(
        kernel,
        out_shape=tuple(out_shape),
        grid=(B, n_q),
        in_specs=in_specs,
        out_specs=tuple(out_specs),
        scratch_shapes=scratch_shapes,
        compiler_params=pltpu.CompilerParams(
            dimension_semantics=("parallel", "arbitrary"),
            vmem_limit_bytes=64 * 1024 * 1024),
    )(x, pos, x, pos,
      p["wq"], p["bq"], p["wk"], p["bk"], p["wv"], p["bv"],
      p["wo"], p["bo"], p["w1"], p["b1"], p["w2"], p["b2"],
      p["g1"], p["be1"], p["g2"], p["be2"])

    if return_weights:
        return outs[0], outs[1]
    return outs[0], None


def transformer_encoder(src, pos, layer_params, *, nhead, q_tile=None):
    """src, pos: (S, B, D) — PyTorch MultiheadAttention layout. norm=None (post-norm layers).

    Returns (output (S, B, D), attention weights of the last layer (B, S, S))."""
    x = jnp.transpose(src, (1, 0, 2))        # (B, S, D)
    p_emb = jnp.transpose(pos, (1, 0, 2))
    n = len(layer_params)
    weights = None
    for i, p in enumerate(layer_params):
        prepped = prepare_layer_params(p, nhead)
        x, w = encoder_layer_pallas(x, p_emb, prepped, nhead=nhead, q_tile=q_tile,
                                    return_weights=(i == n - 1))
        if w is not None:
            weights = w
    return jnp.transpose(x, (1, 0, 2)), weights


# ---------- pure-JAX f32 reference (correctness sanity check) ----------
def _layer_ref(x, pos, p, nhead):
    B, S, D = x.shape
    hd = D // nhead
    qk = x + pos
    q = (qk @ p["wq"] + p["bq"]) / jnp.sqrt(hd)
    k = qk @ p["wk"] + p["bk"]
    v = x @ p["wv"] + p["bv"]
    q = q.reshape(B, S, nhead, hd).transpose(0, 2, 1, 3)
    k = k.reshape(B, S, nhead, hd).transpose(0, 2, 1, 3)
    v = v.reshape(B, S, nhead, hd).transpose(0, 2, 1, 3)
    s = jnp.einsum("bhqd,bhkd->bhqk", q, k)
    probs = jax.nn.softmax(s, axis=-1)
    ctx = jnp.einsum("bhqk,bhkd->bhqd", probs, v).transpose(0, 2, 1, 3).reshape(B, S, D)
    attn_out = ctx @ p["wo"] + p["bo"]
    w = probs.mean(axis=1)

    def ln(z, g, b):
        mu = z.mean(-1, keepdims=True)
        var = ((z - mu) ** 2).mean(-1, keepdims=True)
        return (z - mu) / jnp.sqrt(var + 1e-5) * g + b

    x = ln(x + attn_out, p["g1"], p["be1"])
    ff = jnp.maximum(x @ p["w1"] + p["b1"], 0.0) @ p["w2"] + p["b2"]
    x = ln(x + ff, p["g2"], p["be2"])
    return x, w


def _encoder_ref(src, pos, layer_params, nhead):
    x = jnp.transpose(src, (1, 0, 2))
    p_emb = jnp.transpose(pos, (1, 0, 2))
    w = None
    for p in layer_params:
        x, w = _layer_ref(x, p_emb, p, nhead)
    return jnp.transpose(x, (1, 0, 2)), w


def make_layer_params(key, d_model, nhead, dim_ff):
    ks = jax.random.split(key, 8)
    s = 0.1
    return {
        "wq": s * jax.random.normal(ks[0], (d_model, d_model), jnp.float32),
        "wk": s * jax.random.normal(ks[1], (d_model, d_model), jnp.float32),
        "wv": s * jax.random.normal(ks[2], (d_model, d_model), jnp.float32),
        "bq": s * jax.random.normal(ks[3], (1, d_model), jnp.float32),
        "bk": jnp.zeros((1, d_model), jnp.float32),
        "bv": jnp.zeros((1, d_model), jnp.float32),
        "wo": s * jax.random.normal(ks[4], (d_model, d_model), jnp.float32),
        "bo": jnp.zeros((1, d_model), jnp.float32),
        "w1": s * jax.random.normal(ks[5], (d_model, dim_ff), jnp.float32),
        "b1": s * jax.random.normal(ks[6], (1, dim_ff), jnp.float32),
        "w2": s * jax.random.normal(ks[7], (dim_ff, d_model), jnp.float32),
        "b2": jnp.zeros((1, d_model), jnp.float32),
        "g1": jnp.ones((1, d_model), jnp.float32),
        "be1": jnp.zeros((1, d_model), jnp.float32),
        "g2": jnp.ones((1, d_model), jnp.float32),
        "be2": jnp.zeros((1, d_model), jnp.float32),
    }


if __name__ == "__main__":
    S, B, D = 16, 2, 32          # seq, batch, d_model
    NHEAD, DIM_FF, NUM_LAYERS = 4, 64, 2

    key = jax.random.PRNGKey(0)
    k_src, k_pos, k_par = jax.random.split(key, 3)
    src = jax.random.normal(k_src, (S, B, D), jnp.float32)
    pos = jax.random.normal(k_pos, (S, B, D), jnp.float32)
    layer_params = [make_layer_params(k, D, NHEAD, DIM_FF)
                    for k in jax.random.split(k_par, NUM_LAYERS)]

    # q_tile=8 exercises the (batch, q-tile) grid and K/V scratch reuse across q-tiles.
    out, attn_w = transformer_encoder(src, pos, layer_params, nhead=NHEAD, q_tile=8)
    out = jax.block_until_ready(out)
    attn_w = jax.block_until_ready(attn_w)

    ref_out, ref_w = _encoder_ref(src, pos, layer_params, NHEAD)
    assert out.shape == (S, B, D) and attn_w.shape == (B, S, S)
    # bf16 matmuls + approx reciprocal vs f32 reference -> loose tolerance
    assert jnp.allclose(out, ref_out, atol=5e-2, rtol=5e-2), \
        float(jnp.max(jnp.abs(out - ref_out)))
    assert jnp.allclose(attn_w, ref_w, atol=5e-2, rtol=5e-2), \
        float(jnp.max(jnp.abs(attn_w - ref_w)))

    print("KERNEL_OK")
</pallas_src>

<mosaic_0001>
module attributes {stable_mosaic.version = 11 : i64} {
  func.func @encoder_layer_kernel(%arg0: i32, %arg1: i32, %arg2: memref<1x8x32xf32, #tpu.memory_space<vmem>>, %arg3: memref<1x8x32xf32, #tpu.memory_space<vmem>>, %arg4: memref<1x16x32xf32, #tpu.memory_space<vmem>>, %arg5: memref<1x16x32xf32, #tpu.memory_space<vmem>>, %arg6: memref<32x32xbf16, #tpu.memory_space<vmem>>, %arg7: memref<1x32xf32, #tpu.memory_space<vmem>>, %arg8: memref<32x32xbf16, #tpu.memory_space<vmem>>, %arg9: memref<1x32xf32, #tpu.memory_space<vmem>>, %arg10: memref<32x32xbf16, #tpu.memory_space<vmem>>, %arg11: memref<1x32xf32, #tpu.memory_space<vmem>>, %arg12: memref<32x32xbf16, #tpu.memory_space<vmem>>, %arg13: memref<1x32xf32, #tpu.memory_space<vmem>>, %arg14: memref<32x64xbf16, #tpu.memory_space<vmem>>, %arg15: memref<1x64xf32, #tpu.memory_space<vmem>>, %arg16: memref<64x32xbf16, #tpu.memory_space<vmem>>, %arg17: memref<1x32xf32, #tpu.memory_space<vmem>>, %arg18: memref<1x32xf32, #tpu.memory_space<vmem>>, %arg19: memref<1x32xf32, #tpu.memory_space<vmem>>, %arg20: memref<1x32xf32, #tpu.memory_space<vmem>>, %arg21: memref<1x32xf32, #tpu.memory_space<vmem>>, %arg22: memref<1x8x32xf32, #tpu.memory_space<vmem>>, %arg23: memref<16x32xbf16, #tpu.memory_space<vmem>>, %arg24: memref<16x32xbf16, #tpu.memory_space<vmem>>, %arg25: memref<8x32xbf16, #tpu.memory_space<vmem>>) attributes {dimension_semantics = [#tpu.dimension_semantics<parallel>, #tpu.dimension_semantics<arbitrary>], iteration_bounds = array<i64: 2, 2>, scalar_prefetch = 0 : i64, scratch_operands = 3 : i64, tpu.core_type = #tpu.core_type<tc>, window_params = [{transform_indices = @transform_0, window_bounds = array<i64: 1, 8, 32>}, {transform_indices = @transform_1, window_bounds = array<i64: 1, 8, 32>}, {transform_indices = @transform_2, window_bounds = array<i64: 1, 16, 32>}, {transform_indices = @transform_3, window_bounds = array<i64: 1, 16, 32>}, {pipeline_mode = #tpu.pipeline_mode<synchronous>, transform_indices = @transform_4, window_bounds = array<i64: 32, 32>}, {pipeline_mode = #tpu.pipeline_mode<synchronous>, transform_indices = @transform_5, window_bounds = array<i64: 1, 32>}, {pipeline_mode = #tpu.pipeline_mode<synchronous>, transform_indices = @transform_6, window_bounds = array<i64: 32, 32>}, {pipeline_mode = #tpu.pipeline_mode<synchronous>, transform_indices = @transform_7, window_bounds = array<i64: 1, 32>}, {pipeline_mode = #tpu.pipeline_mode<synchronous>, transform_indices = @transform_8, window_bounds = array<i64: 32, 32>}, {pipeline_mode = #tpu.pipeline_mode<synchronous>, transform_indices = @transform_9, window_bounds = array<i64: 1, 32>}, {pipeline_mode = #tpu.pipeline_mode<synchronous>, transform_indices = @transform_10, window_bounds = array<i64: 32, 32>}, {pipeline_mode = #tpu.pipeline_mode<synchronous>, transform_indices = @transform_11, window_bounds = array<i64: 1, 32>}, {pipeline_mode = #tpu.pipeline_mode<synchronous>, transform_indices = @transform_12, window_bounds = array<i64: 32, 64>}, {pipeline_mode = #tpu.pipeline_mode<synchronous>, transform_indices = @transform_13, window_bounds = array<i64: 1, 64>}, {pipeline_mode = #tpu.pipeline_mode<synchronous>, transform_indices = @transform_14, window_bounds = array<i64: 64, 32>}, {pipeline_mode = #tpu.pipeline_mode<synchronous>, transform_indices = @transform_15, window_bounds = array<i64: 1, 32>}, {pipeline_mode = #tpu.pipeline_mode<synchronous>, transform_indices = @transform_16, window_bounds = array<i64: 1, 32>}, {pipeline_mode = #tpu.pipeline_mode<synchronous>, transform_indices = @transform_17, window_bounds = array<i64: 1, 32>}, {pipeline_mode = #tpu.pipeline_mode<synchronous>, transform_indices = @transform_18, window_bounds = array<i64: 1, 32>}, {pipeline_mode = #tpu.pipeline_mode<synchronous>, transform_indices = @transform_19, window_bounds = array<i64: 1, 32>}, {transform_indices = @transform_20, window_bounds = array<i64: 1, 8, 32>}]} {
    %c0_i32 = arith.constant 0 : i32
    %0 = arith.cmpi eq, %arg1, %c0_i32 : i32
    %1 = arith.extui %0 : i1 to i32
    %c0_i32_0 = arith.constant 0 : i32
    %2 = arith.cmpi ne, %1, %c0_i32_0 : i32
    scf.if %2 {
      %c0_86 = arith.constant 0 : index
      %c0_87 = arith.constant 0 : index
      %c0_88 = arith.constant 0 : index
      %164 = vector.load %arg4[%c0_86, %c0_87, %c0_88] : memref<1x16x32xf32, #tpu.memory_space<vmem>>, vector<1x16x32xf32>
      %165 = vector.shape_cast %164 : vector<1x16x32xf32> to vector<16x32xf32>
      %c0_89 = arith.constant 0 : index
      %c0_90 = arith.constant 0 : index
      %c0_91 = arith.constant 0 : index
      %166 = vector.load %arg5[%c0_89, %c0_90, %c0_91] : memref<1x16x32xf32, #tpu.memory_space<vmem>>, vector<1x16x32xf32>
      %167 = vector.shape_cast %166 : vector<1x16x32xf32> to vector<16x32xf32>
      %168 = arith.addf %165, %167 : vector<16x32xf32>
      %169 = arith.truncf %168 : vector<16x32xf32> to vector<16x32xbf16>
      %170 = arith.truncf %165 : vector<16x32xf32> to vector<16x32xbf16>
      %c0_92 = arith.constant 0 : index
      %c0_93 = arith.constant 0 : index
      %171 = vector.load %arg8[%c0_92, %c0_93] : memref<32x32xbf16, #tpu.memory_space<vmem>>, vector<32x32xbf16>
      %cst_94 = arith.constant dense<0.000000e+00> : vector<16x32xf32>
      %172 = tpu.matmul %169, %171, %cst_94 {dimension_numbers = #tpu.dot_dimension_numbers<[1], [0], [0], [1], [0, 0, 1, 1], [], []>} : vector<16x32xbf16>, vector<32x32xbf16>, vector<16x32xf32> -> vector<16x32xf32>
      %c0_95 = arith.constant 0 : index
      %c0_96 = arith.constant 0 : index
      %173 = vector.load %arg9[%c0_95, %c0_96] : memref<1x32xf32, #tpu.memory_space<vmem>>, vector<1x32xf32>
      %174 = vector.broadcast %173 : vector<1x32xf32> to vector<16x32xf32>
      %175 = arith.addf %172, %174 : vector<16x32xf32>
      %c0_97 = arith.constant 0 : index
      %c0_98 = arith.constant 0 : index
      %176 = vector.load %arg10[%c0_97, %c0_98] : memref<32x32xbf16, #tpu.memory_space<vmem>>, vector<32x32xbf16>
      %cst_99 = arith.constant dense<0.000000e+00> : vector<16x32xf32>
      %177 = tpu.matmul %170, %176, %cst_99 {dimension_numbers = #tpu.dot_dimension_numbers<[1], [0], [0], [1], [0, 0, 1, 1], [], []>} : vector<16x32xbf16>, vector<32x32xbf16>, vector<16x32xf32> -> vector<16x32xf32>
      %c0_100 = arith.constant 0 : index
      %c0_101 = arith.constant 0 : index
      %178 = vector.load %arg11[%c0_100, %c0_101] : memref<1x32xf32, #tpu.memory_space<vmem>>, vector<1x32xf32>
      %179 = vector.broadcast %178 : vector<1x32xf32> to vector<16x32xf32>
      %180 = arith.addf %177, %179 : vector<16x32xf32>
      %181 = arith.truncf %175 : vector<16x32xf32> to vector<16x32xbf16>
      %c0_102 = arith.constant 0 : index
      %c0_103 = arith.constant 0 : index
      %182 = vector.load %arg23[%c0_102, %c0_103] : memref<16x32xbf16, #tpu.memory_space<vmem>>, vector<16x32xbf16>
      tpu.vector_store %arg23[%c0_102, %c0_103], %181 {strides = array<i32>} : memref<16x32xbf16, #tpu.memory_space<vmem>>, vector<16x32xbf16>,
      %183 = arith.truncf %180 : vector<16x32xf32> to vector<16x32xbf16>
      %c0_104 = arith.constant 0 : index
      %c0_105 = arith.constant 0 : index
      %184 = vector.load %arg24[%c0_104, %c0_105] : memref<16x32xbf16, #tpu.memory_space<vmem>>, vector<16x32xbf16>
      tpu.vector_store %arg24[%c0_104, %c0_105], %183 {strides = array<i32>} : memref<16x32xbf16, #tpu.memory_space<vmem>>, vector<16x32xbf16>,
    } else {
    }
    %c0 = arith.constant 0 : index
    %c0_1 = arith.constant 0 : index
    %c0_2 = arith.constant 0 : index
    %3 = vector.load %arg2[%c0, %c0_1, %c0_2] : memref<1x8x32xf32, #tpu.memory_space<vmem>>, vector<1x8x32xf32>
    %4 = vector.shape_cast %3 : vector<1x8x32xf32> to vector<8x32xf32>
    %c0_3 = arith.constant 0 : index
    %c0_4 = arith.constant 0 : index
    %c0_5 = arith.constant 0 : index
    %5 = vector.load %arg3[%c0_3, %c0_4, %c0_5] : memref<1x8x32xf32, #tpu.memory_space<vmem>>, vector<1x8x32xf32>
    %6 = vector.shape_cast %5 : vector<1x8x32xf32> to vector<8x32xf32>
    %7 = arith.addf %4, %6 : vector<8x32xf32>
    %8 = arith.truncf %7 : vector<8x32xf32> to vector<8x32xbf16>
    %c0_6 = arith.constant 0 : index
    %c0_7 = arith.constant 0 : index
    %9 = vector.load %arg6[%c0_6, %c0_7] : memref<32x32xbf16, #tpu.memory_space<vmem>>, vector<32x32xbf16>
    %cst = arith.constant dense<0.000000e+00> : vector<8x32xf32>
    %10 = tpu.matmul %8, %9, %cst {dimension_numbers = #tpu.dot_dimension_numbers<[1], [0], [0], [1], [0, 0, 1, 1], [], []>} : vector<8x32xbf16>, vector<32x32xbf16>, vector<8x32xf32> -> vector<8x32xf32>
    %c0_8 = arith.constant 0 : index
    %c0_9 = arith.constant 0 : index
    %11 = vector.load %arg7[%c0_8, %c0_9] : memref<1x32xf32, #tpu.memory_space<vmem>>, vector<1x32xf32>
    %12 = vector.broadcast %11 : vector<1x32xf32> to vector<8x32xf32>
    %13 = arith.addf %10, %12 : vector<8x32xf32>
    %14 = arith.truncf %13 : vector<8x32xf32> to vector<8x32xbf16>
    %15 = vector.extract_strided_slice %14 {offsets = [0, 0], sizes = [8, 8], strides = [1, 1]} : vector<8x32xbf16> to vector<8x8xbf16>
    %c0_10 = arith.constant 0 : index
    %c0_11 = arith.constant 0 : index
    %16 = vector.load %arg23[%c0_10, %c0_11] : memref<16x32xbf16, #tpu.memory_space<vmem>>, vector<16x8xbf16>
    %c0_12 = arith.constant 0 : index
    %c0_13 = arith.constant 0 : index
    %17 = vector.load %arg24[%c0_12, %c0_13] : memref<16x32xbf16, #tpu.memory_space<vmem>>, vector<16x8xbf16>
    %cst_14 = arith.constant dense<0.000000e+00> : vector<8x16xf32>
    %18 = tpu.matmul %15, %16, %cst_14 {dimension_numbers = #tpu.dot_dimension_numbers<[1], [1], [0], [0], [0, 0, 1, 0], [], []>} : vector<8x8xbf16>, vector<16x8xbf16>, vector<8x16xf32> -> vector<8x16xf32>
    %cst_15 = arith.constant dense<0xFF800000> : vector<8xf32>
    %19 = vector.multi_reduction <maximumf>, %18, %cst_15 [1] : vector<8x16xf32> to vector<8xf32>
    %20 = vector.shape_cast %19 : vector<8xf32> to vector<8x1xf32>
    %21 = vector.broadcast %20 : vector<8x1xf32> to vector<8x16xf32>
    %22 = arith.subf %18, %21 : vector<8x16xf32>
    %23 = math.exp %22 : vector<8x16xf32>
    %cst_16 = arith.constant dense<0.000000e+00> : vector<8xf32>
    %24 = vector.multi_reduction <add>, %23, %cst_16 [1] : vector<8x16xf32> to vector<8xf32>
    %25 = vector.shape_cast %24 : vector<8xf32> to vector<8x1xf32>
    %26 = tpu.reciprocal %25 {approx = true} : vector<8x1xf32> -> vector<8x1xf32>
    %27 = vector.broadcast %26 : vector<8x1xf32> to vector<8x16xf32>
    %28 = arith.mulf %23, %27 : vector<8x16xf32>
    %29 = arith.truncf %28 : vector<8x16xf32> to vector<8x16xbf16>
    %cst_17 = arith.constant dense<0.000000e+00> : vector<8x8xf32>
    %30 = tpu.matmul %29, %17, %cst_17 {dimension_numbers = #tpu.dot_dimension_numbers<[1], [0], [0], [1], [0, 0, 1, 1], [], []>} : vector<8x16xbf16>, vector<16x8xbf16>, vector<8x8xf32> -> vector<8x8xf32>
    %31 = arith.truncf %30 : vector<8x8xf32> to vector<8x8xbf16>
    %c0_18 = arith.constant 0 : index
    %c0_19 = arith.constant 0 : index
    %32 = vector.load %arg25[%c0_18, %c0_19] : memref<8x32xbf16, #tpu.memory_space<vmem>>, vector<8x8xbf16>
    tpu.vector_store %arg25[%c0_18, %c0_19], %31 {strides = array<i32>} : memref<8x32xbf16, #tpu.memory_space<vmem>>, vector<8x8xbf16>,
    %33 = vector.extract_strided_slice %14 {offsets = [0, 8], sizes = [8, 8], strides = [1, 1]} : vector<8x32xbf16> to vector<8x8xbf16>
    %c0_20 = arith.constant 0 : index
    %c8 = arith.constant 8 : index
    %34 = vector.load %arg23[%c0_20, %c8] : memref<16x32xbf16, #tpu.memory_space<vmem>>, vector<16x8xbf16>
    %c0_21 = arith.constant 0 : index
    %c8_22 = arith.constant 8 : index
    %35 = vector.load %arg24[%c0_21, %c8_22] : memref<16x32xbf16, #tpu.memory_space<vmem>>, vector<16x8xbf16>
    %cst_23 = arith.constant dense<0.000000e+00> : vector<8x16xf32>
    %36 = tpu.matmul %33, %34, %cst_23 {dimension_numbers = #tpu.dot_dimension_numbers<[1], [1], [0], [0], [0, 0, 1, 0], [], []>} : vector<8x8xbf16>, vector<16x8xbf16>, vector<8x16xf32> -> vector<8x16xf32>
    %cst_24 = arith.constant dense<0xFF800000> : vector<8xf32>
    %37 = vector.multi_reduction <maximumf>, %36, %cst_24 [1] : vector<8x16xf32> to vector<8xf32>
    %38 = vector.shape_cast %37 : vector<8xf32> to vector<8x1xf32>
    %39 = vector.broadcast %38 : vector<8x1xf32> to vector<8x16xf32>
    %40 = arith.subf %36, %39 : vector<8x16xf32>
    %41 = math.exp %40 : vector<8x16xf32>
    %cst_25 = arith.constant dense<0.000000e+00> : vector<8xf32>
    %42 = vector.multi_reduction <add>, %41, %cst_25 [1] : vector<8x16xf32> to vector<8xf32>
    %43 = vector.shape_cast %42 : vector<8xf32> to vector<8x1xf32>
    %44 = tpu.reciprocal %43 {approx = true} : vector<8x1xf32> -> vector<8x1xf32>
    %45 = vector.broadcast %44 : vector<8x1xf32> to vector<8x16xf32>
    %46 = arith.mulf %41, %45 : vector<8x16xf32>
    %47 = arith.truncf %46 : vector<8x16xf32> to vector<8x16xbf16>
    %cst_26 = arith.constant dense<0.000000e+00> : vector<8x8xf32>
    %48 = tpu.matmul %47, %35, %cst_26 {dimension_numbers = #tpu.dot_dimension_numbers<[1], [0], [0], [1], [0, 0, 1, 1], [], []>} : vector<8x16xbf16>, vector<16x8xbf16>, vector<8x8xf32> -> vector<8x8xf32>
    %49 = arith.truncf %48 : vector<8x8xf32> to vector<8x8xbf16>
    %c0_27 = arith.constant 0 : index
    %c8_28 = arith.constant 8 : index
    %50 = vector.load %arg25[%c0_27, %c8_28] : memref<8x32xbf16, #tpu.memory_space<vmem>>, vector<8x8xbf16>
    tpu.vector_store %arg25[%c0_27, %c8_28], %49 {strides = array<i32>} : memref<8x32xbf16, #tpu.memory_space<vmem>>, vector<8x8xbf16>,
    %51 = vector.extract_strided_slice %14 {offsets = [0, 16], sizes = [8, 8], strides = [1, 1]} : vector<8x32xbf16> to vector<8x8xbf16>
    %c0_29 = arith.constant 0 : index
    %c16 = arith.constant 16 : index
    %52 = vector.load %arg23[%c0_29, %c16] : memref<16x32xbf16, #tpu.memory_space<vmem>>, vector<16x8xbf16>
    %c0_30 = arith.constant 0 : index
    %c16_31 = arith.constant 16 : index
    %53 = vector.load %arg24[%c0_30, %c16_31] : memref<16x32xbf16, #tpu.memory_space<vmem>>, vector<16x8xbf16>
    %cst_32 = arith.constant dense<0.000000e+00> : vector<8x16xf32>
    %54 = tpu.matmul %51, %52, %cst_32 {dimension_numbers = #tpu.dot_dimension_numbers<[1], [1], [0], [0], [0, 0, 1, 0], [], []>} : vector<8x8xbf16>, vector<16x8xbf16>, vector<8x16xf32> -> vector<8x16xf32>
    %cst_33 = arith.constant dense<0xFF800000> : vector<8xf32>
    %55 = vector.multi_reduction <maximumf>, %54, %cst_33 [1] : vector<8x16xf32> to vector<8xf32>
    %56 = vector.shape_cast %55 : vector<8xf32> to vector<8x1xf32>
    %57 = vector.broadcast %56 : vector<8x1xf32> to vector<8x16xf32>
    %58 = arith.subf %54, %57 : vector<8x16xf32>
    %59 = math.exp %58 : vector<8x16xf32>
    %cst_34 = arith.constant dense<0.000000e+00> : vector<8xf32>
    %60 = vector.multi_reduction <add>, %59, %cst_34 [1] : vector<8x16xf32> to vector<8xf32>
    %61 = vector.shape_cast %60 : vector<8xf32> to vector<8x1xf32>
    %62 = tpu.reciprocal %61 {approx = true} : vector<8x1xf32> -> vector<8x1xf32>
    %63 = vector.broadcast %62 : vector<8x1xf32> to vector<8x16xf32>
    %64 = arith.mulf %59, %63 : vector<8x16xf32>
    %65 = arith.truncf %64 : vector<8x16xf32> to vector<8x16xbf16>
    %cst_35 = arith.constant dense<0.000000e+00> : vector<8x8xf32>
    %66 = tpu.matmul %65, %53, %cst_35 {dimension_numbers = #tpu.dot_dimension_numbers<[1], [0], [0], [1], [0, 0, 1, 1], [], []>} : vector<8x16xbf16>, vector<16x8xbf16>, vector<8x8xf32> -> vector<8x8xf32>
    %67 = arith.truncf %66 : vector<8x8xf32> to vector<8x8xbf16>
    %c0_36 = arith.constant 0 : index
    %c16_37 = arith.constant 16 : index
    %68 = vector.load %arg25[%c0_36, %c16_37] : memref<8x32xbf16, #tpu.memory_space<vmem>>, vector<8x8xbf16>
    tpu.vector_store %arg25[%c0_36, %c16_37], %67 {strides = array<i32>} : memref<8x32xbf16, #tpu.memory_space<vmem>>, vector<8x8xbf16>,
    %69 = vector.extract_strided_slice %14 {offsets = [0, 24], sizes = [8, 8], strides = [1, 1]} : vector<8x32xbf16> to vector<8x8xbf16>
    %c0_38 = arith.constant 0 : index
    %c24 = arith.constant 24 : index
    %70 = vector.load %arg23[%c0_38, %c24] : memref<16x32xbf16, #tpu.memory_space<vmem>>, vector<16x8xbf16>
    %c0_39 = arith.constant 0 : index
    %c24_40 = arith.constant 24 : index
    %71 = vector.load %arg24[%c0_39, %c24_40] : memref<16x32xbf16, #tpu.memory_space<vmem>>, vector<16x8xbf16>
    %cst_41 = arith.constant dense<0.000000e+00> : vector<8x16xf32>
    %72 = tpu.matmul %69, %70, %cst_41 {dimension_numbers = #tpu.dot_dimension_numbers<[1], [1], [0], [0], [0, 0, 1, 0], [], []>} : vector<8x8xbf16>, vector<16x8xbf16>, vector<8x16xf32> -> vector<8x16xf32>
    %cst_42 = arith.constant dense<0xFF800000> : vector<8xf32>
    %73 = vector.multi_reduction <maximumf>, %72, %cst_42 [1] : vector<8x16xf32> to vector<8xf32>
    %74 = vector.shape_cast %73 : vector<8xf32> to vector<8x1xf32>
    %75 = vector.broadcast %74 : vector<8x1xf32> to vector<8x16xf32>
    %76 = arith.subf %72, %75 : vector<8x16xf32>
    %77 = math.exp %76 : vector<8x16xf32>
    %cst_43 = arith.constant dense<0.000000e+00> : vector<8xf32>
    %78 = vector.multi_reduction <add>, %77, %cst_43 [1] : vector<8x16xf32> to vector<8xf32>
    %79 = vector.shape_cast %78 : vector<8xf32> to vector<8x1xf32>
    %80 = tpu.reciprocal %79 {approx = true} : vector<8x1xf32> -> vector<8x1xf32>
    %81 = vector.broadcast %80 : vector<8x1xf32> to vector<8x16xf32>
    %82 = arith.mulf %77, %81 : vector<8x16xf32>
    %83 = arith.truncf %82 : vector<8x16xf32> to vector<8x16xbf16>
    %cst_44 = arith.constant dense<0.000000e+00> : vector<8x8xf32>
    %84 = tpu.matmul %83, %71, %cst_44 {dimension_numbers = #tpu.dot_dimension_numbers<[1], [0], [0], [1], [0, 0, 1, 1], [], []>} : vector<8x16xbf16>, vector<16x8xbf16>, vector<8x8xf32> -> vector<8x8xf32>
    %85 = arith.truncf %84 : vector<8x8xf32> to vector<8x8xbf16>
    %c0_45 = arith.constant 0 : index
    %c24_46 = arith.constant 24 : index
    %86 = vector.load %arg25[%c0_45, %c24_46] : memref<8x32xbf16, #tpu.memory_space<vmem>>, vector<8x8xbf16>
    tpu.vector_store %arg25[%c0_45, %c24_46], %85 {strides = array<i32>} : memref<8x32xbf16, #tpu.memory_space<vmem>>, vector<8x8xbf16>,
    %c0_47 = arith.constant 0 : index
    %c0_48 = arith.constant 0 : index
    %87 = vector.load %arg25[%c0_47, %c0_48] : memref<8x32xbf16, #tpu.memory_space<vmem>>, vector<8x32xbf16>
    %c0_49 = arith.constant 0 : index
    %c0_50 = arith.constant 0 : index
    %88 = vector.load %arg12[%c0_49, %c0_50] : memref<32x32xbf16, #tpu.memory_space<vmem>>, vector<32x32xbf16>
    %cst_51 = arith.constant dense<0.000000e+00> : vector<8x32xf32>
    %89 = tpu.matmul %87, %88, %cst_51 {dimension_numbers = #tpu.dot_dimension_numbers<[1], [0], [0], [1], [0, 0, 1, 1], [], []>} : vector<8x32xbf16>, vector<32x32xbf16>, vector<8x32xf32> -> vector<8x32xf32>
    %c0_52 = arith.constant 0 : index
    %c0_53 = arith.constant 0 : index
    %90 = vector.load %arg13[%c0_52, %c0_53] : memref<1x32xf32, #tpu.memory_space<vmem>>, vector<1x32xf32>
    %91 = vector.broadcast %90 : vector<1x32xf32> to vector<8x32xf32>
    %92 = arith.addf %89, %91 : vector<8x32xf32>
    %93 = arith.addf %4, %92 : vector<8x32xf32>
    %c0_54 = arith.constant 0 : index
    %c0_55 = arith.constant 0 : index
    %94 = vector.load %arg18[%c0_54, %c0_55] : memref<1x32xf32, #tpu.memory_space<vmem>>, vector<1x32xf32>
    %c0_56 = arith.constant 0 : index
    %c0_57 = arith.constant 0 : index
    %95 = vector.load %arg19[%c0_56, %c0_57] : memref<1x32xf32, #tpu.memory_space<vmem>>, vector<1x32xf32>
    %cst_58 = arith.constant dense<0.000000e+00> : vector<8xf32>
    %96 = vector.multi_reduction <add>, %93, %cst_58 [1] : vector<8x32xf32> to vector<8xf32>
    %97 = vector.shape_cast %96 : vector<8xf32> to vector<8x1xf32>
    %cst_59 = arith.constant 3.200000e+01 : f32
    %98 = vector.broadcast %cst_59 : f32 to vector<8x1xf32>
    %99 = arith.divf %97, %98 : vector<8x1xf32>
    %100 = vector.broadcast %99 : vector<8x1xf32> to vector<8x32xf32>
    %101 = arith.subf %93, %100 : vector<8x32xf32>
    %102 = vector.broadcast %99 : vector<8x1xf32> to vector<8x32xf32>
    %103 = arith.subf %93, %102 : vector<8x32xf32>
    %104 = arith.mulf %101, %103 : vector<8x32xf32>
    %cst_60 = arith.constant dense<0.000000e+00> : vector<8xf32>
    %105 = vector.multi_reduction <add>, %104, %cst_60 [1] : vector<8x32xf32> to vector<8xf32>
    %106 = vector.shape_cast %105 : vector<8xf32> to vector<8x1xf32>
    %cst_61 = arith.constant 3.200000e+01 : f32
    %107 = vector.broadcast %cst_61 : f32 to vector<8x1xf32>
    %108 = arith.divf %106, %107 : vector<8x1xf32>
    %109 = vector.broadcast %99 : vector<8x1xf32> to vector<8x32xf32>
    %110 = arith.subf %93, %109 : vector<8x32xf32>
    %cst_62 = arith.constant 9.99999974E-6 : f32
    %111 = vector.broadcast %cst_62 : f32 to vector<8x1xf32>
    %112 = arith.addf %108, %111 : vector<8x1xf32>
    %113 = math.rsqrt %112 : vector<8x1xf32>
    %114 = vector.broadcast %113 : vector<8x1xf32> to vector<8x32xf32>
    %115 = arith.mulf %110, %114 : vector<8x32xf32>
    %116 = vector.broadcast %94 : vector<1x32xf32> to vector<8x32xf32>
    %117 = arith.mulf %115, %116 : vector<8x32xf32>
    %118 = vector.broadcast %95 : vector<1x32xf32> to vector<8x32xf32>
    %119 = arith.addf %117, %118 : vector<8x32xf32>
    %120 = arith.truncf %119 : vector<8x32xf32> to vector<8x32xbf16>
    %c0_63 = arith.constant 0 : index
    %c0_64 = arith.constant 0 : index
    %121 = vector.load %arg14[%c0_63, %c0_64] : memref<32x64xbf16, #tpu.memory_space<vmem>>, vector<32x64xbf16>
    %cst_65 = arith.constant dense<0.000000e+00> : vector<8x64xf32>
    %122 = tpu.matmul %120, %121, %cst_65 {dimension_numbers = #tpu.dot_dimension_numbers<[1], [0], [0], [1], [0, 0, 1, 1], [], []>} : vector<8x32xbf16>, vector<32x64xbf16>, vector<8x64xf32> -> vector<8x64xf32>
    %c0_66 = arith.constant 0 : index
    %c0_67 = arith.constant 0 : index
    %123 = vector.load %arg15[%c0_66, %c0_67] : memref<1x64xf32, #tpu.memory_space<vmem>>, vector<1x64xf32>
    %124 = vector.broadcast %123 : vector<1x64xf32> to vector<8x64xf32>
    %125 = arith.addf %122, %124 : vector<8x64xf32>
    %cst_68 = arith.constant 0.000000e+00 : f32
    %126 = vector.broadcast %cst_68 : f32 to vector<8x64xf32>
    %127 = arith.maximumf %125, %126 : vector<8x64xf32>
    %128 = arith.truncf %127 : vector<8x64xf32> to vector<8x64xbf16>
    %c0_69 = arith.constant 0 : index
    %c0_70 = arith.constant 0 : index
    %129 = vector.load %arg16[%c0_69, %c0_70] : memref<64x32xbf16, #tpu.memory_space<vmem>>, vector<64x32xbf16>
    %cst_71 = arith.constant dense<0.000000e+00> : vector<8x32xf32>
    %130 = tpu.matmul %128, %129, %cst_71 {dimension_numbers = #tpu.dot_dimension_numbers<[1], [0], [0], [1], [0, 0, 1, 1], [], []>} : vector<8x64xbf16>, vector<64x32xbf16>, vector<8x32xf32> -> vector<8x32xf32>
    %c0_72 = arith.constant 0 : index
    %c0_73 = arith.constant 0 : index
    %131 = vector.load %arg17[%c0_72, %c0_73] : memref<1x32xf32, #tpu.memory_space<vmem>>, vector<1x32xf32>
    %132 = vector.broadcast %131 : vector<1x32xf32> to vector<8x32xf32>
    %133 = arith.addf %130, %132 : vector<8x32xf32>
    %134 = arith.addf %119, %133 : vector<8x32xf32>
    %c0_74 = arith.constant 0 : index
    %c0_75 = arith.constant 0 : index
    %135 = vector.load %arg20[%c0_74, %c0_75] : memref<1x32xf32, #tpu.memory_space<vmem>>, vector<1x32xf32>
    %c0_76 = arith.constant 0 : index
    %c0_77 = arith.constant 0 : index
    %136 = vector.load %arg21[%c0_76, %c0_77] : memref<1x32xf32, #tpu.memory_space<vmem>>, vector<1x32xf32>
    %cst_78 = arith.constant dense<0.000000e+00> : vector<8xf32>
    %137 = vector.multi_reduction <add>, %134, %cst_78 [1] : vector<8x32xf32> to vector<8xf32>
    %138 = vector.shape_cast %137 : vector<8xf32> to vector<8x1xf32>
    %cst_79 = arith.constant 3.200000e+01 : f32
    %139 = vector.broadcast %cst_79 : f32 to vector<8x1xf32>
    %140 = arith.divf %138, %139 : vector<8x1xf32>
    %141 = vector.broadcast %140 : vector<8x1xf32> to vector<8x32xf32>
    %142 = arith.subf %134, %141 : vector<8x32xf32>
    %143 = vector.broadcast %140 : vector<8x1xf32> to vector<8x32xf32>
    %144 = arith.subf %134, %143 : vector<8x32xf32>
    %145 = arith.mulf %142, %144 : vector<8x32xf32>
    %cst_80 = arith.constant dense<0.000000e+00> : vector<8xf32>
    %146 = vector.multi_reduction <add>, %145, %cst_80 [1] : vector<8x32xf32> to vector<8xf32>
    %147 = vector.shape_cast %146 : vector<8xf32> to vector<8x1xf32>
    %cst_81 = arith.constant 3.200000e+01 : f32
    %148 = vector.broadcast %cst_81 : f32 to vector<8x1xf32>
    %149 = arith.divf %147, %148 : vector<8x1xf32>
    %150 = vector.broadcast %140 : vector<8x1xf32> to vector<8x32xf32>
    %151 = arith.subf %134, %150 : vector<8x32xf32>
    %cst_82 = arith.constant 9.99999974E-6 : f32
    %152 = vector.broadcast %cst_82 : f32 to vector<8x1xf32>
    %153 = arith.addf %149, %152 : vector<8x1xf32>
    %154 = math.rsqrt %153 : vector<8x1xf32>
    %155 = vector.broadcast %154 : vector<8x1xf32> to vector<8x32xf32>
    %156 = arith.mulf %151, %155 : vector<8x32xf32>
    %157 = vector.broadcast %135 : vector<1x32xf32> to vector<8x32xf32>
    %158 = arith.mulf %156, %157 : vector<8x32xf32>
    %159 = vector.broadcast %136 : vector<1x32xf32> to vector<8x32xf32>
    %160 = arith.addf %158, %159 : vector<8x32xf32>
    %c0_83 = arith.constant 0 : index
    %c0_84 = arith.constant 0 : index
    %c0_85 = arith.constant 0 : index
    %161 = vector.load %arg22[%c0_83, %c0_84, %c0_85] : memref<1x8x32xf32, #tpu.memory_space<vmem>>, vector<1x8x32xf32>
    %162 = vector.shape_cast %161 : vector<1x8x32xf32> to vector<8x32xf32>
    %163 = vector.shape_cast %160 : vector<8x32xf32> to vector<1x8x32xf32>
    tpu.vector_store %arg22[%c0_83, %c0_84, %c0_85], %163 {strides = array<i32>} : memref<1x8x32xf32, #tpu.memory_space<vmem>>, vector<1x8x32xf32>,
    return
  }
  func.func @transform_0(%arg0: i32, %arg1: i32) -> (i32, i32, i32) {
    %c0_i32 = arith.constant 0 : i32
    %c0_i32_0 = arith.constant 0 : i32
    return %arg0, %arg1, %c0_i32 : i32, i32, i32
  }
  func.func @transform_1(%arg0: i32, %arg1: i32) -> (i32, i32, i32) {
    %c0_i32 = arith.constant 0 : i32
    %c0_i32_0 = arith.constant 0 : i32
    return %arg0, %arg1, %c0_i32 : i32, i32, i32
  }
  func.func @transform_2(%arg0: i32, %arg1: i32) -> (i32, i32, i32) {
    %c0_i32 = arith.constant 0 : i32
    %c0_i32_0 = arith.constant 0 : i32
    %c0_i32_1 = arith.constant 0 : i32
    return %arg0, %c0_i32, %c0_i32_0 : i32, i32, i32
  }
  func.func @transform_3(%arg0: i32, %arg1: i32) -> (i32, i32, i32) {
    %c0_i32 = arith.constant 0 : i32
    %c0_i32_0 = arith.constant 0 : i32
    %c0_i32_1 = arith.constant 0 : i32
    return %arg0, %c0_i32, %c0_i32_0 : i32, i32, i32
  }
  func.func @transform_4(%arg0: i32, %arg1: i32) -> (i32, i32) {
    %c0_i32 = arith.constant 0 : i32
    %c0_i32_0 = arith.constant 0 : i32
    %c0_i32_1 = arith.constant 0 : i32
    return %c0_i32, %c0_i32_0 : i32, i32
  }
  func.func @transform_5(%arg0: i32, %arg1: i32) -> (i32, i32) {
    %c0_i32 = arith.constant 0 : i32
    %c0_i32_0 = arith.constant 0 : i32
    %c0_i32_1 = arith.constant 0 : i32
    return %c0_i32, %c0_i32_0 : i32, i32
  }
  func.func @transform_6(%arg0: i32, %arg1: i32) -> (i32, i32) {
    %c0_i32 = arith.constant 0 : i32
    %c0_i32_0 = arith.constant 0 : i32
    %c0_i32_1 = arith.constant 0 : i32
    return %c0_i32, %c0_i32_0 : i32, i32
  }
  func.func @transform_7(%arg0: i32, %arg1: i32) -> (i32, i32) {
    %c0_i32 = arith.constant 0 : i32
    %c0_i32_0 = arith.constant 0 : i32
    %c0_i32_1 = arith.constant 0 : i32
    return %c0_i32, %c0_i32_0 : i32, i32
  }
  func.func @transform_8(%arg0: i32, %arg1: i32) -> (i32, i32) {
    %c0_i32 = arith.constant 0 : i32
    %c0_i32_0 = arith.constant 0 : i32
    %c0_i32_1 = arith.constant 0 : i32
    return %c0_i32, %c0_i32_0 : i32, i32
  }
  func.func @transform_9(%arg0: i32, %arg1: i32) -> (i32, i32) {
    %c0_i32 = arith.constant 0 : i32
    %c0_i32_0 = arith.constant 0 : i32
    %c0_i32_1 = arith.constant 0 : i32
    return %c0_i32, %c0_i32_0 : i32, i32
  }
  func.func @transform_10(%arg0: i32, %arg1: i32) -> (i32, i32) {
    %c0_i32 = arith.constant 0 : i32
    %c0_i32_0 = arith.constant 0 : i32
    %c0_i32_1 = arith.constant 0 : i32
    return %c0_i32, %c0_i32_0 : i32, i32
  }
  func.func @transform_11(%arg0: i32, %arg1: i32) -> (i32, i32) {
    %c0_i32 = arith.constant 0 : i32
    %c0_i32_0 = arith.constant 0 : i32
    %c0_i32_1 = arith.constant 0 : i32
    return %c0_i32, %c0_i32_0 : i32, i32
  }
  func.func @transform_12(%arg0: i32, %arg1: i32) -> (i32, i32) {
    %c0_i32 = arith.constant 0 : i32
    %c0_i32_0 = arith.constant 0 : i32
    %c0_i32_1 = arith.constant 0 : i32
    return %c0_i32, %c0_i32_0 : i32, i32
  }
  func.func @transform_13(%arg0: i32, %arg1: i32) -> (i32, i32) {
    %c0_i32 = arith.constant 0 : i32
    %c0_i32_0 = arith.constant 0 : i32
    %c0_i32_1 = arith.constant 0 : i32
    return %c0_i32, %c0_i32_0 : i32, i32
  }
  func.func @transform_14(%arg0: i32, %arg1: i32) -> (i32, i32) {
    %c0_i32 = arith.constant 0 : i32
    %c0_i32_0 = arith.constant 0 : i32
    %c0_i32_1 = arith.constant 0 : i32
    return %c0_i32, %c0_i32_0 : i32, i32
  }
  func.func @transform_15(%arg0: i32, %arg1: i32) -> (i32, i32) {
    %c0_i32 = arith.constant 0 : i32
    %c0_i32_0 = arith.constant 0 : i32
    %c0_i32_1 = arith.constant 0 : i32
    return %c0_i32, %c0_i32_0 : i32, i32
  }
  func.func @transform_16(%arg0: i32, %arg1: i32) -> (i32, i32) {
    %c0_i32 = arith.constant 0 : i32
    %c0_i32_0 = arith.constant 0 : i32
    %c0_i32_1 = arith.constant 0 : i32
    return %c0_i32, %c0_i32_0 : i32, i32
  }
  func.func @transform_17(%arg0: i32, %arg1: i32) -> (i32, i32) {
    %c0_i32 = arith.constant 0 : i32
    %c0_i32_0 = arith.constant 0 : i32
    %c0_i32_1 = arith.constant 0 : i32
    return %c0_i32, %c0_i32_0 : i32, i32
  }
  func.func @transform_18(%arg0: i32, %arg1: i32) -> (i32, i32) {
    %c0_i32 = arith.constant 0 : i32
    %c0_i32_0 = arith.constant 0 : i32
    %c0_i32_1 = arith.constant 0 : i32
    return %c0_i32, %c0_i32_0 : i32, i32
  }
  func.func @transform_19(%arg0: i32, %arg1: i32) -> (i32, i32) {
    %c0_i32 = arith.constant 0 : i32
    %c0_i32_0 = arith.constant 0 : i32
    %c0_i32_1 = arith.constant 0 : i32
    return %c0_i32, %c0_i32_0 : i32, i32
  }
  func.func @transform_20(%arg0: i32, %arg1: i32) -> (i32, i32, i32) {
    %c0_i32 = arith.constant 0 : i32
    %c0_i32_0 = arith.constant 0 : i32
    return %arg0, %arg1, %c0_i32 : i32, i32, i32
  }
}

</mosaic_0001>

<bundles_post_ra>
// kernel: tpu_custom_call.1
= control target key start
LH: loop header
LB: loop body
LE: loop exit
PB: predicated region body
PF: predicated region fallthrough
CT: control target
= control target key end

     0   :  { %s3466_s0 = inlined_call_operand.vmem [shape: f32[2,16,32], index: 0, kind: input, shape index: {}]   ;;  %s3467_s1 = inlined_call_operand.hbm [shape: f32[2,16,32], index: 1, kind: input, shape index: {}]   ;;  %s3468_s2 = inlined_call_operand.hbm [shape: f32[2,16,32], index: 2, kind: input, shape index: {}]   ;;  %s3469_s3 = inlined_call_operand.hbm [shape: f32[2,16,32], index: 3, kind: input, shape index: {}]   ;;  %s3470_s4 = inlined_call_operand.vmem [shape: bf16[32,32], index: 4, kind: input, shape index: {}]   ;;  %s3471_s5 = inlined_call_operand.vmem [shape: f32[1,32], index: 5, kind: input, shape index: {}]   ;;  %s3472_s6 = inlined_call_operand.hbm [shape: bf16[32,32], index: 6, kind: input, shape index: {}]   ;;  %s3473_s7 = inlined_call_operand.vmem [shape: f32[1,32], index: 7, kind: input, shape index: {}]   ;;  %s3474_s8 = inlined_call_operand.hbm [shape: bf16[32,32], index: 8, kind: input, shape index: {}]   ;;  %s3475_s9 = inlined_call_operand.vmem [shape: f32[1,32], index: 9, kind: input, shape index: {}]   ;;  %s3476_s10 = inlined_call_operand.hbm [shape: bf16[32,32], index: 10, kind: input, shape index: {}]   ;;  %s3477_s11 = inlined_call_operand.vmem [shape: f32[1,32], index: 11, kind: input, shape index: {}]   ;;  %s3478_s12 = inlined_call_operand.hbm [shape: bf16[32,64], index: 12, kind: input, shape index: {}]   ;;  %s3479_s13 = inlined_call_operand.vmem [shape: f32[1,64], index: 13, kind: input, shape index: {}]   ;;  %s3480_s14 = inlined_call_operand.vmem [shape: bf16[64,32], index: 14, kind: input, shape index: {}]   ;;  %s3481_s15 = inlined_call_operand.vmem [shape: f32[1,32], index: 15, kind: input, shape index: {}]   ;;  %s3482_s16 = inlined_call_operand.vmem [shape: f32[1,32], index: 16, kind: input, shape index: {}]   ;;  %s3483_s17 = inlined_call_operand.vmem [shape: f32[1,32], index: 17, kind: input, shape index: {}]   ;;  %s3484_s18 = inlined_call_operand.vmem [shape: f32[1,32], index: 18, kind: input, shape index: {}]   ;;  %s3485_s19 = inlined_call_operand.vmem [shape: f32[1,32], index: 19, kind: input, shape index: {}]   ;;  %s3486_s20 = inlined_call_operand.hbm [shape: f32[2,16,32], index: 20, kind: output, shape index: {}]  }
   0x1   :  { %3509 = sst [smem:[#allocation30_spill]] %s3466_s0 }
   0x2   :  { %3510 = sst [smem:[#allocation31_spill]] %s3467_s1 }
   0x3   :  { %3511 = sst [smem:[#allocation32_spill]] %s3468_s2 }
   0x4   :  { %3512 = sst [smem:[#allocation33_spill]] %s3469_s3 }
   0x5   :  { %3513 = sst [smem:[#allocation34_spill]] %s3470_s4 }
   0x6   :  { %3514 = sst [smem:[#allocation35_spill]] %s3471_s5 }
   0x7   :  { %3515 = sst [smem:[#allocation36_spill]] %s3472_s6 }
   0x8   :  { %3516 = sst [smem:[#allocation37_spill]] %s3473_s7 }
   0x9   :  { %3517 = sst [smem:[#allocation38_spill]] %s3474_s8 }
   0xa   :  { %3518 = sst [smem:[#allocation39_spill]] %s3475_s9 }
   0xb   :  { %3519 = sst [smem:[#allocation40_spill]] %s3476_s10 }
   0xc   :  { %3520 = sst [smem:[#allocation41_spill]] %s3477_s11 }
   0xd   :  { %3521 = sst [smem:[#allocation42_spill]] %s3478_s12 }
   0xe   :  { %3522 = sst [smem:[#allocation43_spill]] %s3479_s13 }
   0xf   :  { %3523 = sst [smem:[#allocation44_spill]] %s3480_s14 }
  0x10   :  { %3524 = sst [smem:[#allocation45_spill]] %s3481_s15 }
  0x11   :  { %3525 = sst [smem:[#allocation46_spill]] %s3482_s16 }
  0x12   :  { %3526 = sst [smem:[#allocation47_spill]] %s3483_s17 }
  0x13   :  { %3527 = sst [smem:[#allocation48_spill]] %s3484_s18 }
  0x14   :  { %3528 = sst [smem:[#allocation49_spill]] %s3485_s19 }
  0x15   :  { %3529 = sst [smem:[#allocation50_spill]] %s3486_s20 }
  0x16   :  { %25 = vsyncpa [#allocation6], 0 }
  0x17   :  { %27 = vsyncpa [#allocation6 + $0x1], 0 }
  0x18   :  { %28 = vsyncpa [#allocation9], 0 }
  0x19   :  { %30 = vsyncpa [#allocation9 + $0x1], 0 }
  0x1a   :  { %31 = vsyncpa [#allocation12], 0 }
  0x1b   :  { %32 = vsyncpa [#allocation15], 0 }
  0x1c   :  { %33 = vsyncpa [#allocation7], 0 }
  0x1d   :  { %35 = vsyncpa [#allocation7 + $0x1], 0  ;;  %s2956_s1 = smov 0   ;;  %s2958_s22 = smov 0  }
  0x1e   :  { %s2960_s23 = smov 0   ;;  %s2962_s24 = smov 0  }
  0x1f   :  { %s2964_s2 = smov 0   ;;  %s2966_s25 = smov 0  }
  0x20   :  { %s2968_s3 = smov 0   ;;  %s2970_s26 = smov 0  }
  0x21   :  { %s2972_s27 = smov 0   ;;  %s2974_s28 = smov 0  }
  0x22   :  { %s2976_s4 = smov 0  }
  0x23 LB: > { %3530 = sst [smem:[#allocation23_spill]] %s2791_s22  ;;  %s3012_s29 = sadd.s32 4294967295, %s2827_s4   ;;  %s2827_s4 = sphi %s2976_s4, %s41_s4   ;;  %s2823_s28 = sphi %s2974_s28, %s3599_s28   ;;  %s2819_s27 = sphi %s2972_s27, %s3598_s27   ;;  %s2815_s26 = sphi %s2970_s26, %s3597_s26   ;;  %s2811_s3 = sphi %s2968_s3, %s3596_s3   ;;  %s2807_s25 = sphi %s2966_s25, %s3595_s25   ;;  %s2803_s2 = sphi %s2964_s2, %s3594_s2   ;;  %s2799_s24 = sphi %s2962_s24, %s3593_s24   ;;  %s2795_s23 = sphi %s2960_s23, %s3592_s23   ;;  %s2791_s22 = sphi %s2958_s22, %s3591_s22   ;;  %s2787_s1 = sphi %s2956_s1, %s3588_s1  }
  0x24   : > { %3531 = sst [smem:[#allocation24_spill]] %s2799_s24  ;;  %p2068_p0 = scmp.ge.s32.totalorder %s2827_s4, 1 }
  0x25   : > { %3532 = sst [smem:[#allocation25_spill]] %s2811_s3  ;;  %p3495_p1 = scmp.eq.s32.totalorder %s3012_s29, 0 }
  0x26   : > { %3533 = sst [smem:[#allocation26_spill]] %s2815_s26  ;;  %p530_p2 = scmp.lt.s32.totalorder %s2827_s4, 5 }
  0x27   : > { %s2829_s0 = smov [#allocation11]   ;;  %s2830_s19 = smov [#allocation14]  }
  0x28   : > { %p3017_p3 = pnand %p2068_p0, %p530_p2  ;;  %s548_s21 = sshll.u32 %s2829_s0, 4  ;;  %s549_s21 = int_to_ptr.vmem [resolvable:$true] %s548_s21 }
  0x29   : > { %s580_s18 = sshll.u32 %s2830_s19, 4  ;;  %s2518_s15 = scalar_lea.vmem %s549_s21, 256  ;;  %s581_s18 = int_to_ptr.vmem [resolvable:$true] %s580_s18 }
  0x2a   : > { %p2322_p4 = pneg %p3017_p3  ;;  %p2519_p7 = scmp.ne.s32.totalorder %s549_s21, %s2518_s15 }
  0x2b   : > { %p2526_p10 = scmp.lt.s32.totalorder %s549_s21, %s549_s21  ;;  %p2527_p11 = scmp.lt.s32.totalorder %s2518_s15, %s2518_s15 }
  0x2c   : > { %p3025_p5 = pnand %p2322_p4, %p3495_p1 }
  0x2d   : > { %p2528_p12 = por %p2527_p11, %p2526_p10 }
  0x2e   : > { %p2509_p6 = pneg %p3025_p5 }
  0x30   : > { %p2521_p8 = pnand %p2519_p7, %p2509_p6 }
  0x32   : > { %p2522_p9 = pneg %p2521_p8 }
  0x34   : > { %p2529_p13 = pnand %p2528_p12, %p2522_p9 }
  0x36   : > { %2532 = shalt.err (!%p2529_p13)
}
  0x37   : > { %s3490_s0 = smov 64   ;;  %s3492_s13 = smov 4  }
  0x38   : > { %s3536_s6 = sld [smem:[#allocation36_spill]]  ;;  %s2544_s16 = scalar_lea.vmem %s581_s18, 256 }
  0x39   : > { %p2545_p0 = scmp.ne.s32.totalorder %s581_s18, %s2544_s16  ;;  %p2552_p7 = scmp.lt.s32.totalorder %s581_s18, %s581_s18 }
  0x3a   : > { %p2553_p8 = scmp.lt.s32.totalorder %s2544_s16, %s2544_s16 }
  0x3b   : > { %p2547_p2 = pnand %p2545_p0, %p2509_p6 }
  0x3c   : > { %p2554_p9 = por %p2553_p8, %p2552_p7 }
  0x3d   : > { %p2548_p4 = pneg %p2547_p2 }
  0x3e   : > { %2325 = dma.hbm_to_vmem [thread:$0]  (!%p3025_p5), %s3536_s6, 256, %s549_s21, [#allocation12], %s3490_s0, %s3490_s0, %s3492_s13  }
  0x3f   : > { %p2555_p10 = pnand %p2554_p9, %p2548_p4 }
  0x41   : > { %2558 = shalt.err (!%p2555_p10)
}
  0x42   : > { %s3537_s10 = sld [smem:[#allocation40_spill]]  ;;  %p98_p11 = scmp.eq.s32.totalorder %s2827_s4, 0 }
  0x43   : > { %p123_p12 = scmp.ne.s32.totalorder %s2795_s23, %s2791_s22  ;;  %p129_p13 = scmp.ne.s32.totalorder %s2791_s22, %s2787_s1 }
  0x44   : > { %p3494_p0 = scmp.lt.s32.totalorder %s2827_s4, 4  ;;  %s662_s14 = sand.u32 1, %s2827_s4  }
  0x45   : > { %p125_p2 = por %p123_p12, %p98_p11  ;;  %p3064_p4 = por %p129_p13, %p3495_p1 }
  0x46   : > { %s664_s17 = sand.u32 1, %s2795_s23   ;;  %s2153_s21 = sshll.u32 %s2823_s28, 8 }
  0x47   : > { %s3538_s16 = scalar_select %p3064_p4, 1, 0 }
  0x48   : > { %2331 = dma.hbm_to_vmem [thread:$0]  (!%p3025_p5), %s3537_s10, 256, %s581_s18, [#allocation15], %s3490_s0, %s3490_s0, %s3492_s13  }
  0x49   : > { %3539 = sst [smem:[#allocation27_spill]] %s3538_s16  ;;  %s2077_s19 = sshll.u32 %s664_s17, 4 }
  0x4a   : > { %s3540_s11 = sld [smem:[#allocation32_spill]]  ;;  %p3077_p7 = pnand %p3494_p0, %p125_p2 }
  0x4b   : > { %s666_s0 = scalar_lea.vmem [#allocation8], %s2077_s19  ;;  %s3081_s10 = scalar_lea.sflag [#allocation9], %s662_s14 }
  0x4c   : > { %s673_s13 = sshll.u32 %s666_s0, 4  ;;  %p3501_p8 = pneg %p3077_p7  ;;  %s674_s13 = int_to_ptr.vmem [resolvable:$true] %s673_s13 }
  0x4d   : > { %s2572_s17 = scalar_lea.vmem %s674_s13, 256  ;;  %s2833_s6 = smov [#allocation8]  }
  0x4e   : > { %p2573_p9 = scmp.ne.s32.totalorder %s674_s13, %s2572_s17 }
  0x50   : > { %s672_s18 = scalar_lea.hbm %s3540_s11, %s2153_s21  ;;  %p2575_p10 = pnand %p2573_p9, %p3501_p8 }
  0x51   : > { %s2577_s11 = sshll.u32 %s2833_s6, 4  ;;  %s2578_s11 = int_to_ptr.vmem [resolvable:$false] %s2577_s11 }
  0x52   : > { %p2576_p12 = pneg %p2575_p10  ;;  %s2579_s15 = scalar_lea.vmem %s2578_s11, 512 }
  0x53   : > { %p2580_p13 = scmp.lt.s32.totalorder %s674_s13, %s2578_s11  ;;  %p2581_p2 = scmp.lt.s32.totalorder %s2579_s15, %s2572_s17 }
  0x55   : > { %p2582_p0 = por %p2581_p2, %p2580_p13 }
  0x57   : > { %p2583_p1 = pnand %p2582_p0, %p2576_p12 }
  0x59   : > { %2586 = shalt.err (!%p2583_p1)
}
  0x5a   : > { %s3502_s0 = smov 128   ;;  %s3503_s14 = smov 8  }
  0x5b   : > { %2341 = dma.hbm_to_vmem [thread:$0]  (!%p3077_p7), %s672_s18, 256, %s674_s13, %s3081_s10, %s3502_s0, %s3502_s0, %s3503_s14  }
  0x5c   : > { %s3542_s9 = sld [smem:[#allocation33_spill]]  ;;  %s687_s17 = scalar_lea.vmem [#allocation10], %s2077_s19 }
  0x5d   : > { %s694_s15 = sshll.u32 %s687_s17, 4  ;;  %s2836_s7 = smov [#allocation13]   ;;  %s3101_s15 = int_to_ptr.vmem [resolvable:$true] %s694_s15 }
  0x5e   : > { %s564_s3 = sshll.u32 %s2836_s7, 4  ;;  %s2837_s26 = smov [#allocation16]   ;;  %s565_s3 = int_to_ptr.vmem [resolvable:$true] %s564_s3 }
  0x5f   : > { %s596_s16 = sshll.u32 %s2837_s26, 4  ;;  %s2598_s22 = scalar_lea.vmem %s565_s3, 256  ;;  %s597_s16 = int_to_ptr.vmem [resolvable:$true] %s596_s16 }
  0x60   : > { %p2599_p1 = scmp.ne.s32.totalorder %s565_s3, %s2598_s22  ;;  %p2606_p10 = scmp.lt.s32.totalorder %s565_s3, %s565_s3 }
  0x61   : > { %p2607_p12 = scmp.lt.s32.totalorder %s2598_s22, %s2598_s22 }
  0x62   : > { %s3099_s11 = scalar_lea.hbm %s3542_s9, %s2153_s21  ;;  %p2601_p0 = pnand %p2599_p1, %p2509_p6 }
  0x63   : > { %p2608_p13 = por %p2607_p12, %p2606_p10 }
  0x64   : > { %p2602_p9 = pneg %p2601_p0 }
  0x66   : > { %p2609_p2 = pnand %p2608_p13, %p2602_p9 }
  0x68   : > { %2612 = shalt.err (!%p2609_p2)
}
  0x69   : > { %s3543_s5 = smov 4   ;;  %s3544_s9 = smov 64  }
  0x6a   : > { %s3545_s8 = sld [smem:[#allocation38_spill]]  ;;  %s2624_s26 = scalar_lea.vmem %s597_s16, 256 }
  0x6b   : > { %p2625_p8 = scmp.ne.s32.totalorder %s597_s16, %s2624_s26  ;;  %p2632_p10 = scmp.lt.s32.totalorder %s597_s16, %s597_s16 }
  0x6c   : > { %p2633_p9 = scmp.lt.s32.totalorder %s2624_s26, %s2624_s26 }
  0x6d   : > { %p2627_p1 = pnand %p2625_p8, %p2509_p6 }
  0x6e   : > { %p2634_p12 = por %p2633_p9, %p2632_p10 }
  0x6f   : > { %p2628_p0 = pneg %p2627_p1 }
  0x70   : > { %2328 = dma.hbm_to_vmem [thread:$0]  (!%p3025_p5), %s3545_s8, 256, %s565_s3, [#allocation12], %s3544_s9, %s3544_s9, %s3543_s5  }
  0x71   : > { %p2635_p13 = pnand %p2634_p12, %p2628_p0 }
  0x73   : > { %2638 = shalt.err (!%p2635_p13)
}
  0x74   : > { %s3546_s12 = sld [smem:[#allocation42_spill]]  ;;  %s2067_s20 = sadd.s32 4294967294, %s2827_s4  }
  0x75   : > { %s50_s3 = sadd.s32 1, %s2819_s27  ;;  %s53_s19 = sadd.s32 1, %s2823_s28 }
  0x76   : > { %p51_p6 = scmp.ge.s32.totalorder %s50_s3, 2  ;;  %s90_s18 = sadd.s32 1, %s2807_s25 }
  0x77   : > { %p97_p8 = scmp.ne.s32.totalorder %s2807_s25, %s2803_s2  ;;  %p103_p2 = scmp.ne.s32.totalorder %s2803_s2, %s2799_s24 }
  0x78   : > { %s3601_s3 = smov (%p51_p6, %s50_s3), 0  ;;  %s3603_s19 = smov (!%p51_p6, %s53_s19), %s2823_s28 }
  0x79   : > { %3547 = sst [smem:[#allocation28_spill]] %s3601_s3  ;;  %s86_s6 = ssub.s32 %s2819_s27, %s3601_s3 }
  0x7a   : > { %2334 = dma.hbm_to_vmem [thread:$0]  (!%p3025_p5), %s3546_s12, 256, %s597_s16, [#allocation15], %s3544_s9, %s3544_s9, %s3543_s5  }
  0x7b   : > { %p3140_p5 = por %p98_p11, %p97_p8  ;;  %p55_p1 = scmp.ge.s32.totalorder %s3603_s19, 2 }
  0x7c   : > { %p3549_p0 = scmp.eq.s32.totalorder %s3012_s29, 0  ;;  %s116_s5 = sadd.s32 1, %s2795_s23 }
  0x7d   : > { %p517_p9 = scmp.eq.s32.totalorder %s3012_s29, 3  ;;  %s3605_s19 = smov (%p55_p1, %s3603_s19), 0 }
  0x7e   : > { %p3149_p10 = por %p3549_p0, %p103_p2  ;;  %3551 = sst [smem:[#allocation29_spill]] %s3605_s19 }
  0x7f   : > { %p3157_p12 = por %p517_p9, %p97_p8  ;;  %p523_p11 = scmp.eq.s32.totalorder %s2067_s20, 3 }
  0x80   : > { %s85_s7 = ssub.s32 %s2823_s28, %s3605_s19  ;;  %s642_s13 = sand.u32 1, %s2807_s25  }
  0x81   : > { %s3552_s9 = scalar_select %p3157_p12, 1, 0 }
  0x82   : > { %s87_s26 = sor.u32 %s86_s6, %s85_s7  ;;  %p114_p13 = scmp.eq.s32.totalorder %s85_s7, 0 }
  0x83   : > { %p88_p6 = scmp.eq.s32.totalorder %s87_s26, 0  ;;  %p3167_p0 = por %p523_p11, %p103_p2 }
  0x84   : > { %s3172_s21 = scalar_select %p114_p13, %s2795_s23, %s116_s5  }
  0x85   : > { %s3553_s22 = scalar_select %p3167_p0, 1, 0 }
  0x86   : > { %s3175_s0 = scalar_select %p88_p6, %s2807_s25, %s90_s18  }
  0x87   : > { %s2074_s20 = sshll.u32 %s642_s13, 3  ;;  %s2075_s14 = sshll.u32 %s2823_s28, 1 }
  0x88   : > { %s651_s8 = sadd.s32 %s2819_s27, %s2075_s14  ;;  %s646_s12 = scalar_lea.vmem [#allocation5], %s2074_s20 }
  0x89   : > { %s655_s6 = sshll.u32 %s646_s12, 4  ;;  %s2076_s19 = sshll.u32 %s651_s8, 7  ;;  %s3181_s6 = int_to_ptr.vmem [resolvable:$true] %s655_s6 }
  0x8a   : > { %s3554_s3 = sld [smem:[#allocation31_spill]]  ;;  %p3555_p8 = scmp.lt.s32.totalorder %s2827_s4, 4 }
  0x8b   : > { %s2652_s5 = scalar_lea.vmem %s3101_s15, 256  ;;  %p3557_p9 = pneg %p3077_p7 }
  0x8c   : > { %p3192_p2 = pnand %p3555_p8, %p3140_p5  ;;  %p2653_p1 = scmp.ne.s32.totalorder %s3101_s15, %s2652_s5 }
  0x8d   : > { %s2838_s8 = smov [#allocation10]  }
  0x8e   : > { %p2655_p11 = pnand %p2653_p1, %p3557_p9  ;;  %s2657_s12 = sshll.u32 %s2838_s8, 4  ;;  %s2658_s12 = int_to_ptr.vmem [resolvable:$false] %s2657_s12 }
  0x8f   : > { %s2659_s14 = scalar_lea.vmem %s2658_s12, 512  ;;  %p2660_p6 = scmp.lt.s32.totalorder %s3101_s15, %s2658_s12 }
  0x90   : > { %s3186_s24 = scalar_lea.hbm %s3554_s3, %s2076_s19  ;;  %p2656_p13 = pneg %p2655_p11 }
  0x91   : > { %p2661_p0 = scmp.lt.s32.totalorder %s2659_s14, %s2652_s5 }
  0x93   : > { %p2662_p12 = por %p2661_p0, %p2660_p6 }
  0x95   : > { %p2663_p4 = pnand %p2662_p12, %p2656_p13 }
  0x97   : > { %2666 = shalt.err (!%p2663_p4)
}
  0x98   : > { %s3558_s3 = smov 8   ;;  %s3559_s19 = smov 128  }
  0x99   : > { %2344 = dma.hbm_to_vmem [thread:$0]  (!%p3077_p7), %s3099_s11, 256, %s3101_s15, %s3081_s10, %s3559_s19, %s3559_s19, %s3558_s3  }
  0x9a   : > { %s643_s16 = scalar_lea.sflag [#allocation6], %s642_s13  ;;  %p2669_p5 = pneg %p3192_p2 }
  0x9b   : > { %s2680_s20 = scalar_lea.vmem %s3181_s6, 128  ;;  %s2839_s1 = smov [#allocation5]  }
  0x9c   : > { %p2681_p4 = scmp.ne.s32.totalorder %s3181_s6, %s2680_s20  ;;  %s2685_s7 = sshll.u32 %s2839_s1, 4  ;;  %s2686_s7 = int_to_ptr.vmem [resolvable:$false] %s2685_s7 }
  0x9d   : > { %s2687_s26 = scalar_lea.vmem %s2686_s7, 256  ;;  %p2688_p8 = scmp.lt.s32.totalorder %s3181_s6, %s2686_s7 }
  0x9e   : > { %p2683_p12 = pnand %p2681_p4, %p2669_p5  ;;  %p2689_p1 = scmp.lt.s32.totalorder %s2687_s26, %s2680_s20 }
  0xa0   : > { %p2684_p0 = pneg %p2683_p12  ;;  %p2690_p9 = por %p2689_p1, %p2688_p8 }
  0xa2   : > { %p2691_p11 = pnand %p2690_p9, %p2684_p0 }
  0xa4   : > { %2694 = shalt.err (!%p2691_p11)
}
  0xa5   : > { %2338 = dma.hbm_to_vmem [thread:$0]  (!%p3192_p2), %s3186_s24, 128, %s3181_s6, %s643_s16  }
  0xa6   : > { %706 = sbr.rel (%p3017_p3) target bundleno = 2806 (0xaf6), region = 100  ;;  %s3224_s10 = sand.u32 (!%p3017_p3), 1, %s2803_s2  }
  0xa7   : > { %s2084_s11 = sshll.u32 (!%p3017_p3), %s3224_s10, 3  ;;  %s709_s15 = scalar_lea.sflag (!%p3017_p3), [#allocation6], %s3224_s10 }
  0xa8   : > { %s3228_s13 = scalar_lea.vmem (!%p3017_p3), [#allocation5], %s2084_s11 }
  0xab   : > { %2766 = dma.done.wait (%p3149_p10), %s709_s15, 128  }
  0xac   : > { %2768 = vsyncadd (%p3149_p10), %s709_s15, 4294967168  ;;  %s3560_s24 = sld [smem:[#allocation23_spill]]  ;;  %s717_s30 = sand.u32 1, %s3012_s29  }
  0xad   : > { %s3561_s6 = sld [smem:[#allocation27_spill]]  ;;  %s718_s8 = scalar_lea.sflag [#allocation9], %s717_s30 }
  0xb2   : > { %s719_s18 = sand.u32 1, %s3560_s24  }
  0xb3   : > { %s3236_s5 = sshll.u32 %s719_s18, 4  ;;  %p3562_p3 = scmp.ne.s32.totalorder %s3561_s6, 0 }
  0xb4   : > { %s721_s12 = scalar_lea.vmem [#allocation8], %s3236_s5 }
  0xb5   : > { %2770 = dma.done.wait (%p3562_p3), %s718_s8, 512  }
  0xb6   : > { %2772 = vsyncadd (%p3562_p3), %s718_s8, 4294966784  ;;  %s730_s14 = scalar_lea.vmem [#allocation10], %s3236_s5  ;;  %p3563_p7 = scmp.eq.s32.totalorder %s3012_s29, 0 }
  0xb8   : > { %2774 = dma.done.wait (%p3563_p7), [#allocation12], 512   ;;  %p3564_p10 = pmov %p3563_p7 }
  0xb9   : > { %p3565_p2 = pmov %p3563_p7 }
  0xba   : > { %2776 = vsyncadd (%p3564_p10), [#allocation12], 4294966784 }
  0xbb   : > { %2778 = dma.done.wait (%p3565_p2), [#allocation15], 512   ;;  %p3566_p13 = pmov %p3565_p2 }
  0xbc   : > { %s3567_s17 = sld [smem:[#allocation26_spill]]  ;;  %s3261_s6 = scalar_lea.vmem [#allocation17], %s2084_s11 }
  0xbd   : > { %2780 = vsyncadd (%p3566_p13), [#allocation15], 4294966784  ;;  %s3568_s3 = sld [smem:[#allocation25_spill]] }
  0xbe   : > { %s3569_s15 = sld [smem:[#allocation30_spill]] }
  0xc2   : > { %p821_p6 = scmp.lt.s32.totalorder %s3567_s17, 1 }
  0xc3   : > { %p823_p5 = scmp.lt.s32.totalorder %s3568_s3, 1  ;;  %p2094_p4 = scmp.ne.s32.totalorder %s3568_s3, 0 }
  0xc4   : > { %s3607_s17 = smov (!%p821_p6, %s3567_s17), 1  ;;  %s3570_s30 = sld [smem:[#allocation37_spill]] (!%p2094_p4) }
  0xc5   : > { %s824_s19 = scalar_select %p823_p5, %s3568_s3, 1 }
  0xc6   : > { %s2092_s16 = sshll.u32 %s3607_s17, 1  ;;  %833 = sbr.rel (%p2094_p4) target bundleno = 415 (0x19f), region = 132 }
  0xc7   : > { %s826_s20 = sadd.s32 %s2092_s16, %s824_s19 }
  0xc8   : > { %s2093_s1 = sshll.u32 %s826_s20, 3 }
  0xc9   : > { %s3259_s24 = scalar_lea.vmem %s3569_s15, %s2093_s1 }
  0xcb   : > { %v2465_v0 = vld [vmem:[#allocation11 + $0x8] sm:$0xff]   ;;  %v2840_v1 = vmov 0.0   ;;  %v2466_v2 = vld [vmem:[#allocation13 + $0x8] sm:$0xff]   ;;  %v2467_v3 = vld [vmem:[#allocation11] sm:$0xff]   ;;  %vm2841_vm0 = vmmov 0   ;;  %vm865_vm1 = vcmask 261120  }
  0xcc   : > { %2198 = vmatprep.subr.bf16.mxu0 %v2840_v1  ;;  %2206 = vmatprep.subr.bf16.mxu1 %v2840_v1  ;;  %v2468_v4 = vld [vmem:[#allocation13] sm:$0xff]   ;;  %v835_v6 = vld [vmem:[%s721_s12 + $0x8] sm:$0xff]  ;;  %vm985_vm2 = vcmask 257024  }
  0xcd   : > { %2199 = vmatpush3.bf16.msra.mxu0 %v2465_v0  ;;  %2202 = vmatprep.mubr.msk.bf16.mxu0 %vm2841_vm0, %v2840_v1  ;;  %v834_v5 = vld [vmem:[%s721_s12] sm:$0xff]  ;;  %v837_v8 = vld [vmem:[%s730_s14 + $0x8] sm:$0xff]  ;;  %s3571_s12 = sld [smem:[#allocation39_spill]] }
  0xce   : > { %2207 = vmatpush3.bf16.msra.mxu1 %v2466_v2  ;;  %2200 = vmatprep.subr.bf16.mxu0 %v2840_v1  ;;  %v836_v7 = vld [vmem:[%s730_s14] sm:$0xff]  ;;  %v839_v10 = vadd.f32 %v837_v8, %v835_v6  ;;  %v841_v11 = vpack.c.bf16 %v835_v6, %v834_v5  ;;  %v2095_v13 = vld [vmem:[%s3570_s30] ss:$0 sm:$0xff] }
  0xcf   : > { %2208 = vmatprep.subr.bf16.mxu1 %v2840_v1  ;;  %2210 = vmatprep.mubr.msk.bf16.mxu1 %vm2841_vm0, %v2840_v1  ;;  %v838_v9 = vadd.f32 %v836_v7, %v834_v5 }
  0xd1   : > { %2201 = vmatpush3.bf16.msra.mxu0 %v2467_v3  ;;  %v840_v12 = vpack.c.bf16 %v839_v10, %v838_v9 }
  0xd2   : > { %2209 = vmatpush3.bf16.msra.mxu1 %v2468_v4 }
  0xd3   : > { %v2099_v14 = vld [vmem:[%s3571_s12] ss:$0 sm:$0xff] }
  0xd4   : > { %2203 = vmatmul.mubr.msk.bf16.vlgmr.msra.gmra.mxu0 %vm865_vm1, %v840_v12 }
  0xd5   : > { %2211 = vmatmul.mubr.msk.bf16.vlgmr.msra.gmra.mxu1 %vm865_vm1, %v841_v11 }
 0x194   : > { %v903_v15 = vpop.f32.mrf.mxu0 }
 0x195   : > { %v970_v16 = vpop.f32.mrf.mxu1  ;;  %v904_v17 = vadd.f32 %v2095_v13, %v903_v15 }
 0x196   : > { %v971_v18 = vadd.f32 %v2099_v14, %v970_v16  ;;  %v2204_v19 = vpop.f32.mrf.mxu0 }
 0x197   : > { %v2212_v20 = vpop.f32.mrf.mxu1  ;;  %v2155_v21 = vpack.c.bf16 %v904_v17, %v904_v17 }
 0x198   : > { %v2157_v22 = vpack.c.bf16 %v971_v18, %v971_v18  ;;  %v906_v23 = vpop.f32.mrf.mxu0 }
 0x199   : > { %v973_v24 = vpop.f32.mrf.mxu1  ;;  %986 = vst.msk [vmem:[#allocation2] sm:$0xf] %vm985_vm2, %v2155_v21  ;;  %v907_v25 = vadd.f32 %v2095_v13, %v906_v23 }
 0x19a   : > { %996 = vst.msk [vmem:[#allocation3] sm:$0xf] %vm985_vm2, %v2157_v22  ;;  %v974_v26 = vadd.f32 %v2099_v14, %v973_v24  ;;  %v2205_v27 = vpop.f32.mrf.mxu0 }
 0x19b   : > { %v2213_v28 = vpop.f32.mrf.mxu1  ;;  %v2156_v29 = vpack.c.bf16 %v907_v25, %v907_v25 }
 0x19c   : > { %v2158_v30 = vpack.c.bf16 %v974_v26, %v974_v26 }
 0x19d   : > { %987 = vst.msk [vmem:[#allocation2 + $0x4] sm:$0xf] %vm985_vm2, %v2156_v29 }
 0x19e   : > { %997 = vst.msk [vmem:[#allocation3 + $0x4] sm:$0xf] %vm985_vm2, %v2158_v30 }
 0x19f PF: > { %s3572_s17 = sld [smem:[#allocation34_spill]]  ;;  %v2842_v32 = vmov 0.0   ;;  %vm2843_vm3 = vmmov 0   ;;  %v3293_v34 = vld [vmem:[%s3259_s24] sm:$0xff]  ;;  %vm1079_vm4 = vcmask 64512   ;;  %s2844_s16 = smov 120  }
 0x1a0   : > { %2214 = vmatprep.subr.bf16.mxu0 %v2842_v32  ;;  %2222 = vmatprep.subr.bf16.mxu1 %v2842_v32  ;;  %v999_v35 = vld [vmem:[%s3228_s13] sm:$0xff]  ;;  %vm1025_vm5 = vcmask 261120   ;;  %s2845_s13 = smov 112   ;;  %s3573_s7 = sld [smem:[#allocation35_spill]]  ;;  %vm1126_vm6 = vcmask 130048   ;;  %vm1189_vm7 = vcmask 60416  }
 0x1a1   : > { %2218 = vmatprep.mubr.msk.bf16.mxu0 %vm2843_vm3, %v2842_v32  ;;  %v1000_v36 = vadd.f32 %v999_v35, %v3293_v34  ;;  %2224 = vmatprep.mubr.msk.bf16.mxu1 %vm2843_vm3, %v2842_v32  ;;  %s2846_s26 = smov 104   ;;  %s2847_s15 = smov 8   ;;  %vm1321_vm8 = vcmask 126016   ;;  %vm1452_vm9 = vcmask 191616   ;;  %vm1583_vm10 = vcmask 257216  }
 0x1a2   : > { %s2848_s24 = smov 16   ;;  %s2849_s29 = smov 24   ;;  %vm1791_vm11 = vcmask 523264  }
 0x1a3   : > { %v1001_v39 = vpack.c.bf16 %v1000_v36, %v1000_v36  ;;  %s3574_s18 = sld [smem:[#allocation41_spill]]  ;;  %s1882_s11 = sshll.u32 %s3261_s6, 4  ;;  %s1883_s11 = int_to_ptr.vmem [resolvable:$true] %s1882_s11 }
 0x1a4   : > { %v2471_v37 = vld [vmem:[#allocation2] sm:$0xff]   ;;  %s3575_s5 = sld [smem:[#allocation44_spill]]  ;;  %p3585_p0 = scmp.ne.s32.totalorder %s3552_s9, 0 }
 0x1a5   : > { %v2469_v31 = vld [vmem:[%s3572_s17 + $0x8] sm:$0xff]   ;;  %v2470_v33 = vld [vmem:[%s3572_s17] sm:$0xff]   ;;  %1203 = vrot.lane.b32.xlu0 %v2471_v37, %s2844_s16  ;;  %s3579_s14 = sld [smem:[#allocation45_spill]] }
 0x1a6   : > { %2215 = vmatpush3.bf16.msra.mxu0 %v2469_v31  ;;  %v2472_v38 = vld [vmem:[#allocation2] sm:$0xff]   ;;  %v2476_v20 = vld [vmem:[#allocation3] sm:$0xff]   ;;  %s3580_s3 = sld [smem:[#allocation26_spill]] }
 0x1a7   : > { %2216 = vmatprep.subr.bf16.mxu0 %v2842_v32  ;;  %v1084_v40 = vsel %vm1079_vm4, %v2472_v38, 0  ;;  %v2473_v41 = vld [vmem:[#allocation2] sm:$0xff]   ;;  %v2475_v21 = vld [vmem:[#allocation3] sm:$0xff]   ;;  %s3581_s19 = sld [smem:[#allocation25_spill]] }
 0x1a8   : > { %2223 = vmatpush3.bf16.xpose.msra.mxu1 %v1084_v40  ;;  %1334 = vrot.lane.b32.xlu1 %v2473_v41, %s2845_s13  ;;  %v2107_v42 = vld [vmem:[%s3573_s7] ss:$0 sm:$0xff]  ;;  %v2477_v41 = vld [vmem:[#allocation3] sm:$0xff]   ;;  %s3577_s7 = sld [smem:[#allocation47_spill]] }
 0x1a9   : > { %2234 = vmatprep.subr.bf16.mxu1 %v2842_v32  ;;  %v2474_v50 = vld [vmem:[#allocation2] sm:$0xff]   ;;  %s3584_s8 = sld [smem:[#allocation50_spill]] }
 0x1aa   : > { %2217 = vmatpush3.bf16.msra.mxu0 %v2470_v33 }
 0x1ab   : > { %2228 = vmatprep.subr.bf16.mxu0 %v2842_v32 }
 0x1ad   : > { %2219 = vmatmul.mubr.msk.bf16.vlgmr.msra.gmra.mxu0 %vm1025_vm5, %v1001_v39  ;;  %v2478_v39 = vld [vmem:[#allocation3] sm:$0xff]  }
 0x1ae   : > { %2230 = vmatprep.mubr.msk.bf16.mxu0 %vm2843_vm3, %v2842_v32  ;;  %2229 = vmatpush3.bf16.msra.mxu0 %v2476_v20 }
 0x1af   : > { %2240 = vmatprep.subr.bf16.mxu0 %v2842_v32 }
 0x217   : > { %v1204_v45 = vpop.permute.xlu0 %1203 }
 0x218   : > { %v1209_v49 = vsel %vm1079_vm4, %v1204_v45, 0 }
 0x21a   : > { %v1335_v52 = vpop.permute.xlu1 %1334 }
 0x21b   : > { %v1340_v53 = vsel %vm1079_vm4, %v1335_v52, 0 }
 0x26d   : > { %v1063_v43 = vpop.f32.mrf.mxu0 }
 0x26e   : > { %v1064_v44 = vadd.f32 %v2107_v42, %v1063_v43 }
 0x26f   : > { %v2220_v46 = vpop.f32.mrf.mxu0 }
 0x270   : > { %v1069_v47 = vpack.c.bf16 %v1064_v44, %v1064_v44 }
 0x271   : > { %v1066_v48 = vpop.f32.mrf.mxu0 }
 0x272   : > { %1327 = vrot.lane.b32.xlu1 %v1069_v47, %s2845_s13  ;;  %1196 = vrot.lane.b32.xlu0 %v1069_v47, %s2844_s16 }
 0x273   : > { %2225 = vmatmul.mubr.msk.bf16.vlgmr.msra.gmra.mxu1 %vm1079_vm4, %v1069_v47  ;;  %v2221_v51 = vpop.f32.mrf.mxu0 }
 0x274   : > { %2235 = vmatpush3.bf16.xpose.msra.mxu1 %v1209_v49  ;;  %2236 = vmatprep.mubr.msk.bf16.mxu1 %vm2843_vm3, %v2842_v32 }
 0x275   : > { %2246 = vmatprep.subr.bf16.mxu1 %v2842_v32 }
 0x276   : > { %1458 = vrot.lane.b32.xlu1 %v1069_v47, %s2846_s26  ;;  %1465 = vrot.lane.b32.xlu0 %v2474_v50, %s2846_s26 }
 0x2e4   : > { %v1197_v54 = vpop.permute.xlu0 %1196  ;;  %v1328_v57 = vpop.permute.xlu1 %1327 }
 0x2e5   : > { %2237 = vmatmul.mubr.msk.bf16.vlgmr.msra.gmra.mxu1 %vm1079_vm4, %v1197_v54 }
 0x2e6   : > { %2247 = vmatpush3.bf16.xpose.msra.mxu1 %v1340_v53  ;;  %2248 = vmatprep.mubr.msk.bf16.mxu1 %vm2843_vm3, %v2842_v32 }
 0x2e7   : > { %2258 = vmatprep.subr.bf16.mxu1 %v2842_v32 }
 0x2e8   : > { %v1466_v55 = vpop.permute.xlu0 %1465  ;;  %v1459_v58 = vpop.permute.xlu1 %1458 }
 0x2e9   : > { %v1471_v56 = vsel %vm1079_vm4, %v1466_v55, 0 }
 0x2ed   : > { %2249 = vmatmul.mubr.msk.bf16.vlgmr.msra.gmra.mxu1 %vm1079_vm4, %v1328_v57 }
 0x2ee   : > { %2259 = vmatpush3.bf16.xpose.msra.mxu1 %v1471_v56  ;;  %2260 = vmatprep.mubr.msk.bf16.mxu1 %vm2843_vm3, %v2842_v32 }
 0x2ef   : > { %2270 = vmatprep.subr.bf16.mxu1 %v2842_v32 }
 0x2f5   : > { %2261 = vmatmul.mubr.msk.bf16.vlgmr.msra.gmra.mxu1 %vm1079_vm4, %v1459_v58 }
 0x2f6   : > { %2274 = vmatprep.mubr.msk.bf16.mxu1 %vm2843_vm3, %v2842_v32 }
 0x333   : > { %v1120_v59 = vpop.f32.mrf.mxu1 }
 0x334   : > { %v1127_v60 = vsel %vm1126_vm6, %v1120_v59, -inf }
 0x335   : > { %1128 = vmax.xlane.f32.xlu0 %v1127_v60  ;;  %v2226_v61 = vpop.f32.mrf.mxu1 }
 0x337   : > { %v1123_v62 = vpop.f32.mrf.mxu1 }
 0x339   : > { %v2227_v63 = vpop.f32.mrf.mxu1 }
 0x3a5   : > { %v1245_v0 = vpop.f32.mrf.mxu1 }
 0x3a6   : > { %v1251_v1 = vsel %vm1126_vm6, %v1245_v0, -inf }
 0x3a7   : > { %1252 = vmax.xlane.f32.xlu1 %v1251_v1  ;;  %v2238_v2 = vpop.f32.mrf.mxu1 }
 0x3a9   : > { %v1248_v3 = vpop.f32.mrf.mxu1 }
 0x3ab   : > { %v2239_v4 = vpop.f32.mrf.mxu1 }
 0x3ad   : > { %v1376_v5 = vpop.f32.mrf.mxu1 }
 0x3ae   : > { %v1382_v6 = vsel %vm1126_vm6, %v1376_v5, -inf }
 0x3af   : > { %1383 = vmax.xlane.f32.xlu0 %v1382_v6  ;;  %v2250_v7 = vpop.f32.mrf.mxu1  ;;  %v2479_v6 = vld [vmem:[#allocation14 + $0x8] sm:$0xff]  }
 0x3b0   : > { %2271 = vmatpush3.bf16.msra.mxu1 %v2479_v6 }
 0x3b1   : > { %v1379_v8 = vpop.f32.mrf.mxu1  ;;  %2272 = vmatprep.subr.bf16.mxu1 %v2842_v32 }
 0x3b2   : > { %v2480_v8 = vld [vmem:[#allocation14] sm:$0xff]  }
 0x3b3   : > { %v2251_v9 = vpop.f32.mrf.mxu1 }
 0x3b4   : > { %2273 = vmatpush3.bf16.msra.mxu1 %v2480_v8 }
 0x3b5   : > { %v1507_v10 = vpop.f32.mrf.mxu1  ;;  %2286 = vmatprep.subr.bf16.mxu1 %v2842_v32 }
 0x3b6   : > { %v1513_v11 = vsel %vm1126_vm6, %v1507_v10, -inf }
 0x3b7   : > { %1514 = vmax.xlane.f32.xlu0 %v1513_v11  ;;  %v2262_v12 = vpop.f32.mrf.mxu1 }
 0x3b9   : > { %v1510_v13 = vpop.f32.mrf.mxu1 }
 0x3bb   : > { %v2263_v14 = vpop.f32.mrf.mxu1 }
 0x3be   : > { %v1129_v15 = vpop.xlane.xlu0 %1128 }
 0x3bf   : > { %v1130_v16 = vsub.f32 %v1120_v59, %v1129_v15 }
 0x3c1   : > { %v1131_v17 = vmul.f32 1.442695, %v1130_v16 }
 0x3c3   : > { %2487 = vpow2.f32 %v1131_v17 }
 0x3d0   : > { %v2488_v18 = vpop.eup %2487 }
 0x3d1   : > { %v1133_v19 = vsel %vm1126_vm6, %v2488_v18, 0.0 }
 0x3d2   : > { %1134 = vadd.xlane.f32.xlu1 %v1133_v19 }
 0x3e3   : > { %1268 = vrot.lane.b32.xlu1 %v2475_v21, %s2844_s16  ;;  %s2149_s16 = sshll.u32 %s3580_s3, 1  ;;  %s2695_s3 = scalar_lea.vmem %s1883_s11, 128 }
 0x3e4   : > { %p2696_p12 = scmp.ne.s32.totalorder %s1883_s11, %s2695_s3 }
 0x3e6   : > { %p2697_p8 = pnand %p2696_p12, %p3585_p0 }
 0x3e8   : > { %p2698_p1 = pneg %p2697_p8 }
 0x430   : > { %v1253_v22 = vpop.xlane.xlu1 %1252 }
 0x431   : > { %v1254_v23 = vsub.f32 %v1245_v0, %v1253_v22  ;;  %v2130_v22 = vld [vmem:[%s3574_s18] ss:$0 sm:$0xff]  ;;  %s3578_s18 = sld [smem:[#allocation43_spill]] }
 0x433   : > { %v1255_v24 = vmul.f32 1.442695, %v1254_v23 }
 0x435   : > { %2489 = vpow2.f32 %v1255_v24 }
 0x438   : > { %v1384_v25 = vpop.xlane.xlu0 %1383 }
 0x439   : > { %v1385_v26 = vsub.f32 %v1376_v5, %v1384_v25 }
 0x43b   : > { %v1386_v27 = vmul.f32 1.442695, %v1385_v26 }
 0x43d   : > { %2491 = vpow2.f32 %v1386_v27 }
 0x440   : > { %v1515_v28 = vpop.xlane.xlu0 %1514 }
 0x441   : > { %v1516_v29 = vsub.f32 %v1507_v10, %v1515_v28 }
 0x442   : > { %v2490_v30 = vpop.eup %2489 }
 0x443   : > { %v1517_v31 = vmul.f32 1.442695, %v1516_v29  ;;  %v1257_v33 = vsel %vm1126_vm6, %v2490_v30, 0.0 }
 0x444   : > { %1258 = vadd.xlane.f32.xlu0 %v1257_v33 }
 0x445   : > { %2493 = vpow2.f32 %v1517_v31 }
 0x44a   : > { %v2492_v35 = vpop.eup %2491 }
 0x44b   : > { %v1388_v36 = vsel %vm1126_vm6, %v2492_v35, 0.0 }
 0x44c   : > { %1389 = vadd.xlane.f32.xlu1 %v1388_v36 }
 0x452   : > { %v2494_v37 = vpop.eup %2493 }
 0x453   : > { %v1519_v38 = vsel %vm1126_vm6, %v2494_v37, 0.0 }
 0x454   : > { %1520 = vadd.xlane.f32.xlu0 %v1519_v38  ;;  %v2482_v38 = vld [vmem:[#allocation16] sm:$0xff]  }
 0x45b   : > { %v1135_v40 = vpop.xlane.xlu1 %1134 }
 0x45c   : > { %2495 = vrcp.f32 %v1135_v40 }
 0x45d   : > { %1530 = vrot.lane.b32.xlu1 %v2478_v39, %s2846_s26  ;;  %v2484_v39 = vld [vmem:[%s3575_s5 + $0x10] sm:$0xff]  }
 0x45f   : > { %v1269_v45 = vpop.permute.xlu1 %1268 }
 0x469   : > { %v2496_v42 = vpop.eup %2495 }
 0x46a   : > { %v1137_v43 = vmul.f32 %v2496_v42, %v2488_v18  ;;  %1399 = vrot.lane.b32.xlu0 %v2477_v41, %s2845_s13  ;;  %s3576_s13 = sld [smem:[#allocation46_spill]] }
 0x46c   : > { %v1138_v44 = vpack.c.bf16 %v1137_v43, %v1137_v43 }
 0x46e   : > { %2231 = vmatmul.mubr.msk.bf16.vlgmr.msra.gmra.mxu0 %vm1126_vm6, %v1138_v44 }
 0x46f   : > { %2241 = vmatpush3.bf16.msra.mxu0 %v1269_v45  ;;  %2242 = vmatprep.mubr.msk.bf16.mxu0 %vm2843_vm3, %v2842_v32 }
 0x470   : > { %2252 = vmatprep.subr.bf16.mxu0 %v2842_v32  ;;  %v2134_v44 = vld [vmem:[%s3576_s13] ss:$0 sm:$0xff]  ;;  %s1878_s13 = sadd.s32 %s3581_s19, %s2149_s16  ;;  %s2850_s19 = smov [#allocation17]  }
 0x471   : > { %s2699_s16 = sshll.u32 %s2850_s19, 4  ;;  %s2700_s16 = int_to_ptr.vmem [resolvable:$false] %s2699_s16 }
 0x472   : > { %p2702_p9 = scmp.lt.s32.totalorder %s1883_s11, %s2700_s16 }
 0x4cd   : > { %v1259_v46 = vpop.xlane.xlu0 %1258 }
 0x4ce   : > { %2497 = vrcp.f32 %v1259_v46  ;;  %v2135_v46 = vld [vmem:[%s3577_s7] ss:$0 sm:$0xff]  ;;  %s3582_s7 = sld [smem:[#allocation48_spill]] }
 0x4d5   : > { %v1390_v47 = vpop.xlane.xlu1 %1389 }
 0x4d6   : > { %2499 = vrcp.f32 %v1390_v47 }
 0x4d9   : > { %v1531_v56 = vpop.permute.xlu1 %1530 }
 0x4db   : > { %v2498_v48 = vpop.eup %2497 }
 0x4dc   : > { %v1261_v49 = vmul.f32 %v2498_v48, %v2490_v30 }
 0x4dd   : > { %v1521_v50 = vpop.xlane.xlu0 %1520 }
 0x4de   : > { %2501 = vrcp.f32 %v1521_v50  ;;  %v1262_v51 = vpack.c.bf16 %v1261_v49, %v1261_v49  ;;  %v2485_v50 = vld [vmem:[%s3575_s5 + $0x8] sm:$0xff]  }
 0x4e0   : > { %2243 = vmatmul.mubr.msk.bf16.vlgmr.msra.gmra.mxu0 %vm1126_vm6, %v1262_v51  ;;  %v2486_v51 = vld [vmem:[%s3575_s5] sm:$0xff]  }
 0x4e1   : > { %v1400_v52 = vpop.permute.xlu0 %1399  ;;  %2254 = vmatprep.mubr.msk.bf16.mxu0 %vm2843_vm3, %v2842_v32 }
 0x4e2   : > { %2253 = vmatpush3.bf16.msra.mxu0 %v1400_v52  ;;  %v2136_v52 = vld [vmem:[%s3578_s18] ss:$0 sm:$0xff] }
 0x4e3   : > { %v2500_v53 = vpop.eup %2499  ;;  %2264 = vmatprep.subr.bf16.mxu0 %v2842_v32 }
 0x4e4   : > { %v1392_v54 = vmul.f32 %v2500_v53, %v2492_v35 }
 0x4e6   : > { %v1393_v55 = vpack.c.bf16 %v1392_v54, %v1392_v54 }
 0x4e8   : > { %2255 = vmatmul.mubr.msk.bf16.vlgmr.msra.gmra.mxu0 %vm1126_vm6, %v1393_v55 }
 0x4e9   : > { %2265 = vmatpush3.bf16.msra.mxu0 %v1531_v56  ;;  %2266 = vmatprep.mubr.msk.bf16.mxu0 %vm2843_vm3, %v2842_v32 }
 0x4ea   : > { %2278 = vmatprep.subr.bf16.mxu0 %v2842_v32 }
 0x4eb   : > { %v2502_v57 = vpop.eup %2501 }
 0x4ec   : > { %v1523_v58 = vmul.f32 %v2502_v57, %v2494_v37  ;;  %v2481_v37 = vld [vmem:[#allocation16 + $0x8] sm:$0xff]  }
 0x4ee   : > { %v1524_v59 = vpack.c.bf16 %v1523_v58, %v1523_v58 }
 0x4f0   : > { %2267 = vmatmul.mubr.msk.bf16.vlgmr.msra.gmra.mxu0 %vm1126_vm6, %v1524_v59 }
 0x4f1   : > { %2282 = vmatprep.mubr.msk.bf16.mxu0 %vm2843_vm3, %v2842_v32  ;;  %2279 = vmatpush3.bf16.msra.mxu0 %v2481_v37 }
 0x4f2   : > { %2280 = vmatprep.subr.bf16.mxu0 %v2842_v32 }
 0x4f5   : > { %2281 = vmatpush3.bf16.msra.mxu0 %v2482_v38 }
 0x52e   : > { %v1182_v60 = vpop.f32.mrf.mxu0 }
 0x52f   : > { %v1188_v61 = vpack.c.bf16 %v1182_v60, %v1182_v60 }
 0x530   : > { %v2232_v62 = vpop.f32.mrf.mxu0 }
 0x531   : > { %1190 = vst.msk [vmem:[#allocation4] sm:$0xf] %vm1189_vm7, %v1188_v61 }
 0x532   : > { %v1185_v63 = vpop.f32.mrf.mxu0 }
 0x534   : > { %v2233_v0 = vpop.f32.mrf.mxu0 }
 0x5a0   : > { %v1308_v1 = vpop.f32.mrf.mxu0 }
 0x5a1   : > { %v2159_v2 = vpack.c.bf16 %v1308_v1, %v1308_v1 }
 0x5a2   : > { %v2244_v3 = vpop.f32.mrf.mxu0 }
 0x5a3   : > { %1318 = vrot.lane.b32.xlu1 %v2159_v2, %s2847_s15 }
 0x5a4   : > { %v1311_v4 = vpop.f32.mrf.mxu0 }
 0x5a6   : > { %v2245_v5 = vpop.f32.mrf.mxu0 }
 0x5a8   : > { %v1439_v7 = vpop.f32.mrf.mxu0 }
 0x5a9   : > { %v2160_v9 = vpack.c.bf16 %v1439_v7, %v1439_v7 }
 0x5aa   : > { %v2256_v10 = vpop.f32.mrf.mxu0 }
 0x5ab   : > { %1449 = vrot.lane.b32.xlu0 %v2160_v9, %s2848_s24  ;;  %s3583_s24 = sld [smem:[#allocation49_spill]] }
 0x5ac   : > { %v1442_v11 = vpop.f32.mrf.mxu0 }
 0x5ae   : > { %v2257_v12 = vpop.f32.mrf.mxu0 }
 0x5af   : > { %v2146_v12 = vld [vmem:[%s3582_s7] ss:$0 sm:$0xff] }
 0x5b0   : > { %v1570_v13 = vpop.f32.mrf.mxu0 }
 0x5b1   : > { %v2161_v14 = vpack.c.bf16 %v1570_v13, %v1570_v13 }
 0x5b2   : > { %v2268_v15 = vpop.f32.mrf.mxu0 }
 0x5b3   : > { %1580 = vrot.lane.b32.xlu1 %v2161_v14, %s2849_s29  ;;  %v2147_v14 = vld [vmem:[%s3583_s24] ss:$0 sm:$0xff]  ;;  %s2150_s29 = sshll.u32 %s1878_s13, 7  ;;  %s2701_s13 = scalar_lea.vmem %s2700_s16, 256 }
 0x5b4   : > { %v1573_v16 = vpop.f32.mrf.mxu0  ;;  %s1880_s12 = scalar_lea.hbm %s3584_s8, %s2150_s29  ;;  %p2703_p11 = scmp.lt.s32.totalorder %s2701_s13, %s2695_s3 }
 0x5b6   : > { %v2269_v17 = vpop.f32.mrf.mxu0  ;;  %p2704_p3 = por %p2703_p11, %p2702_p9 }
 0x5b8   : > { %p2705_p7 = pnand %p2704_p3, %p2698_p1 }
 0x615   : > { %v1319_v18 = vpop.permute.xlu1 %1318 }
 0x616   : > { %1322 = vst.msk [vmem:[#allocation4] sm:$0xf] %vm1321_vm8, %v1319_v18 }
 0x61d   : > { %v1450_v19 = vpop.permute.xlu0 %1449 }
 0x61e   : > { %1453 = vst.msk [vmem:[#allocation4] sm:$0xf] %vm1452_vm9, %v1450_v19 }
 0x625   : > { %v1581_v20 = vpop.permute.xlu1 %1580 }
 0x626   : > { %1584 = vst.msk [vmem:[#allocation4] sm:$0xf] %vm1583_vm10, %v1581_v20 }
 0x62d   : > { %v1585_v21 = vld [vmem:[#allocation4] sm:$0xf] }
 0x62e   : > { %2275 = vmatmul.mubr.msk.bf16.vlgmr.msra.gmra.mxu1 %vm1025_vm5, %v1585_v21 }
 0x62f   : > { %2294 = vmatprep.mubr.msk.bf16.mxu1 %vm2843_vm3, %v2842_v32 }
 0x6ee   : > { %v1646_v23 = vpop.f32.mrf.mxu1 }
 0x6ef   : > { %v1647_v24 = vadd.f32 %v2130_v22, %v1646_v23 }
 0x6f0   : > { %v2276_v25 = vpop.f32.mrf.mxu1 }
 0x6f1   : > { %v1652_v26 = vadd.f32 %v1647_v24, %v3293_v34  ;;  %v2483_v34 = vld [vmem:[%s3575_s5 + $0x18] sm:$0xff]  }
 0x6f2   : > { %v1649_v27 = vpop.f32.mrf.mxu1  ;;  %2287 = vmatpush3.bf16.msra.mxu1 %v2483_v34 }
 0x6f3   : > { %v1655_v28 = vsel %vm1025_vm5, %v1652_v26, 0.0  ;;  %2288 = vmatprep.subr.bf16.mxu1 %v2842_v32 }
 0x6f4   : > { %1656 = vadd.xlane.f32.xlu0 %v1655_v28  ;;  %v2277_v29 = vpop.f32.mrf.mxu1 }
 0x6f6   : > { %2289 = vmatpush3.bf16.msra.mxu1 %v2484_v39 }
 0x6f7   : > { %2290 = vmatprep.subr.bf16.mxu1 %v2842_v32 }
 0x6fa   : > { %2291 = vmatpush3.bf16.msra.mxu1 %v2485_v50 }
 0x6fb   : > { %2292 = vmatprep.subr.bf16.mxu1 %v2842_v32  ;;  %v2140_v32 = vld [vmem:[%s3579_s14] ss:$0 sm:$0xff]  ;;  %s1867_s14 = scalar_lea.sflag [#allocation7], %s3224_s10 }
 0x6fe   : > { %2293 = vmatpush3.bf16.msra.mxu1 %v2486_v51 }
 0x77d   : > { %v1657_v30 = vpop.xlane.xlu0 %1656 }
 0x77e   : > { %v1659_v31 = vmul.f32 0.03125, %v1657_v30 }
 0x780   : > { %v1660_v33 = vsub.f32 %v1652_v26, %v1659_v31 }
 0x782   : > { %v1661_v35 = vmul.f32 %v1660_v33, %v1660_v33 }
 0x784   : > { %v1662_v36 = vsel %vm1025_vm5, %v1661_v35, 0.0 }
 0x785   : > { %1663 = vadd.xlane.f32.xlu1 %v1662_v36 }
 0x80e   : > { %v1664_v40 = vpop.xlane.xlu1 %1663 }
 0x80f   : > { %v1665_v41 = vmul.f32 0.03125, %v1664_v40 }
 0x811   : > { %v1666_v42 = vadd.f32 1e-05, %v1665_v41 }
 0x813   : > { %2503 = vrsqrt.f32 %v1666_v42 }
 0x820   : > { %v2504_v43 = vpop.eup %2503 }
 0x821   : > { %v1668_v45 = vmul.f32 %v2504_v43, %v1660_v33 }
 0x823   : > { %v1675_v47 = vmul.f32 %v2134_v44, %v1668_v45 }
 0x825   : > { %v1682_v48 = vadd.f32 %v2135_v46, %v1675_v47 }
 0x827   : > { %v1683_v49 = vpack.c.bf16 %v1682_v48, %v1682_v48 }
 0x829   : > { %2283 = vmatmul.mubr.msk.bf16.vlgmr.msra.gmra.mxu0 %vm1025_vm5, %v1683_v49 }
 0x8e9   : > { %v1744_v53 = vpop.f32.mrf.mxu0 }
 0x8ea   : > { %v1745_v54 = vadd.f32 %v2136_v52, %v1744_v53 }
 0x8eb   : > { %v2284_v55 = vpop.f32.mrf.mxu0 }
 0x8ec   : > { %v1750_v56 = vmax.f32 %v1745_v54, 0.0 }
 0x8ed   : > { %v1747_v57 = vpop.f32.mrf.mxu0 }
 0x8ee   : > { %v1751_v58 = vpack.c.bf16 %v1750_v56, %v1750_v56 }
 0x8ef   : > { %v2285_v59 = vpop.f32.mrf.mxu0 }
 0x8f0   : > { %2295 = vmatmul.mubr.msk.bf16.vlgmr.msra.gmra.mxu1 %vm1791_vm11, %v1751_v58 }
 0x9b0   : > { %v1829_v60 = vpop.f32.mrf.mxu1 }
 0x9b1   : > { %v1830_v61 = vadd.f32 %v2140_v32, %v1829_v60 }
 0x9b2   : > { %v2296_v62 = vpop.f32.mrf.mxu1 }
 0x9b3   : > { %v1835_v63 = vadd.f32 %v1830_v61, %v1682_v48 }
 0x9b4   : > { %v1832_v0 = vpop.f32.mrf.mxu1 }
 0x9b5   : > { %v1838_v1 = vsel %vm1025_vm5, %v1835_v63, 0.0 }
 0x9b6   : > { %1839 = vadd.xlane.f32.xlu0 %v1838_v1  ;;  %v2297_v2 = vpop.f32.mrf.mxu1 }
 0xa3f   : > { %v1840_v3 = vpop.xlane.xlu0 %1839 }
 0xa40   : > { %v1841_v4 = vmul.f32 0.03125, %v1840_v3 }
 0xa42   : > { %v1842_v5 = vsub.f32 %v1835_v63, %v1841_v4 }
 0xa44   : > { %v1843_v6 = vmul.f32 %v1842_v5, %v1842_v5 }
 0xa46   : > { %v1844_v7 = vsel %vm1025_vm5, %v1843_v6, 0.0 }
 0xa47   : > { %1845 = vadd.xlane.f32.xlu0 %v1844_v7 }
 0xad0   : > { %v1846_v8 = vpop.xlane.xlu0 %1845 }
 0xad1   : > { %v1847_v9 = vmul.f32 0.03125, %v1846_v8 }
 0xad3   : > { %v1848_v10 = vadd.f32 1e-05, %v1847_v9 }
 0xad5   : > { %2505 = vrsqrt.f32 %v1848_v10 }
 0xae2   : > { %v2506_v11 = vpop.eup %2505 }
 0xae3   : > { %v1850_v13 = vmul.f32 %v2506_v11, %v1842_v5 }
 0xae5   : > { %v1857_v15 = vmul.f32 %v2146_v12, %v1850_v13 }
 0xae7   : > { %v1864_v16 = vadd.f32 %v2147_v14, %v1857_v15 }
 0xae9   : > { %1865 = vst.msk [vmem:[%s3261_s6] sm:$0xff] %vm1025_vm5, %v1864_v16 }
 0xaea   : > { %2708 = shalt.err (!%p2705_p7)
}
 0xaeb   : > { %s2709_s20 = scalar_lea.hbm %s1880_s12, 128  ;;  %s2713_s1 = scalar_lea.hbm %s3584_s8, 512 }
 0xaec   : > { %p2710_p10 = scmp.ne.s32.totalorder %s1880_s12, %s2709_s20  ;;  %p2714_p6 = scmp.lt.s32.totalorder %s1880_s12, %s3584_s8 }
 0xaed   : > { %p2715_p5 = scmp.lt.s32.totalorder %s2713_s1, %s2709_s20 }
 0xaee   : > { %p2711_p2 = pnand %p2710_p10, %p3585_p0 }
 0xaef   : > { %p2716_p4 = por %p2715_p5, %p2714_p6 }
 0xaf0   : > { %p2712_p13 = pneg %p2711_p2 }
 0xaf2   : > { %p2717_p12 = pnand %p2716_p4, %p2712_p13 }
 0xaf4   : > { %2720 = shalt.err (!%p2717_p12)
}
 0xaf5   : > { %2320 = dma.vmem_to_hbm [thread:$0]  (%p3585_p0), %s1883_s11, 128, %s1880_s12, %s1867_s14  }
 0xaf6 PF: > { %s3586_s15 = sld [smem:[#allocation24_spill]]  ;;  %p2358_p8 = scmp.ge.s32.totalorder %s2827_s4, 2 }
 0xaf7   : > { %p3587_p1 = scmp.ne.s32.totalorder %s3553_s22, 0 }
 0xaf9   : > { %p2346_p9 = pnand %p2358_p8, %p3587_p1 }
 0xafb   : > { %p2347_p11 = pneg %p2346_p9 }
 0xafc   : > { %s1894_s24 = sand.u32 1, %s3586_s15  }
 0xafd   : > { %s1895_s29 = scalar_lea.sflag [#allocation7], %s1894_s24 }
 0xafe   : > { %2782 = dma.done.wait (%p2347_p11), %s1895_s29, 128  }
 0xaff   : > { %2784 = vsyncadd (%p2347_p11), %s1895_s29, 4294967168  ;;  %s41_s4 = sadd.s32 1, %s2827_s4   ;;  %s3588_s1 = sld [smem:[#allocation23_spill]] }
 0xb00   : > { %p38_p3 = scmp.ge.s32.totalorder %s41_s4, 6   ;;  %s3589_s9 = sld [smem:[#allocation28_spill]] }
 0xb01   : > { %s3590_s11 = sld [smem:[#allocation29_spill]]  ;;  %s3591_s22 = smov %s2795_s23 }
 0xb02   : > { %s3592_s23 = smov %s3172_s21  ;;  %s3593_s24 = smov %s2803_s2 }
 0xb03   : > { %s3594_s2 = smov %s2807_s25  ;;  %s3595_s25 = smov %s3175_s0 }
 0xb04   : > { %s3596_s3 = smov %s2819_s27  ;;  %s3597_s26 = smov %s2823_s28 }
 0xb05   :  { %40 = sbr.rel (!%p38_p3) target bundleno = 35 (0x23), region = 192 }
 0xb06   : > { %s3598_s27 = smov %s3589_s9 }
 0xb07   : > { %s3599_s28 = smov %s3590_s11 }
 0xb0a   :  { %1900 = vsyncpa [#allocation6], 1 }
 0xb0b   :  { %1902 = vsyncpa [#allocation6 + $0x1], 1 }
 0xb0c   :  { %1903 = vsyncpa [#allocation9], 1 }
 0xb0d   :  { %1905 = vsyncpa [#allocation9 + $0x1], 1 }
 0xb0e   :  { %1906 = vsyncpa [#allocation12], 1 }
 0xb0f   :  { %1907 = vsyncpa [#allocation15], 1 }
 0xb10   :  { %1908 = vsyncpa [#allocation7], 1 }
 0xb11   :  { %1910 = vsyncpa [#allocation7 + $0x1], 1 }

</bundles_post_ra>
